<compile_context>
chip_gen: v7x
topology: tpu7x:2x2x1
jax: 0.10.0
libtpu: 0.0.40
codegen_flags: <defaults>
</compile_context>

<pallas_src>
import functools

import jax
import jax.numpy as jnp
from jax.experimental import pallas as pl
from jax.experimental.pallas import tpu as pltpu


# --------------------------------------------------------------------------
# Kernel 1: fused [optional bn+relu on the input] + 3x3 conv (im2col, single
# matmul) + per-channel partial BN statistics (sum, sum of squares).
# Grid = (n_cout_tiles, N); batch axis is the stats-accumulation axis (last).
# --------------------------------------------------------------------------
def _conv_stats_kernel(scale_ref, shift_ref, x_ref, w_ref,
                       out_ref, sum_ref, sumsq_ref, xpad_ref,
                       *, stride, apply_in_bn):
    i = pl.program_id(1)                      # batch index (reduction axis)

    h = x_ref.shape[1]
    w = x_ref.shape[2]
    cin = x_ref.shape[3]
    oh = out_ref.shape[1]
    ow = out_ref.shape[2]
    cout_t = out_ref.shape[3]

    # Init resident blocks / scratch at the start of every batch sweep.  Only
    # the interior of xpad is overwritten below, so the 1-pixel border stays
    # zero (the conv's zero padding).
    @pl.when(i == 0)
    def _():
        xpad_ref[...] = jnp.zeros_like(xpad_ref)
        sum_ref[...] = jnp.zeros_like(sum_ref)
        sumsq_ref[...] = jnp.zeros_like(sumsq_ref)

    x = x_ref[0]                              # (H, W, Cin), native dtype
    if apply_in_bn:
        # Fused bn1 + relu1 applied to the input tile of conv2 (per-channel
        # affine in f32, then cast back to the MXU input dtype).
        xf = x.astype(jnp.float32)
        xf = jnp.maximum(xf * scale_ref[...] + shift_ref[...], 0.0)
        x = xf.astype(xpad_ref.dtype)
    xpad_ref[1:h + 1, 1:w + 1, :] = x

    # im2col: concat the 9 shifted taps along the channel axis -> one MXU
    # matmul with K = 9*Cin instead of 9 tiny K=Cin matmuls.
    taps = []
    for kh in range(3):
        for kw in range(3):
            if stride == 1:
                taps.append(xpad_ref[kh:kh + oh, kw:kw + ow, :])
            else:
                # TODO(synk): for stride>1 a space-to-depth transform at DMA
                # time would avoid strided VMEM reads entirely.
                taps.append(xpad_ref[pl.ds(kh, oh, stride),
                                     pl.ds(kw, ow, stride), :])
    patches = jnp.concatenate(taps, axis=-1).reshape(oh * ow, 9 * cin)

    # Native-dtype MXU matmul, f32 accumulation.
    acc = jnp.dot(patches, w_ref[...], preferred_element_type=jnp.float32)

    out_ref[...] = acc.reshape(1, oh, ow, cout_t).astype(out_ref.dtype)

    # Single-pass BN partial statistics, accumulated across the batch axis in
    # resident output blocks (global N*H*W stats, finalized in the wrapper).
    sum_ref[...] += jnp.sum(acc, axis=0, keepdims=True)
    sumsq_ref[...] += jnp.sum(acc * acc, axis=0, keepdims=True)


def _conv_stats(x, w2d, scale_in, shift_in, *, stride, apply_in_bn, cout):
    n, h, w, cin = x.shape
    oh = (h - 1) // stride + 1
    ow = (w - 1) // stride + 1
    cout_t = 128 if cout % 128 == 0 else cout     # lane-dense Cout tiles
    n_ct = cout // cout_t

    kernel = functools.partial(_conv_stats_kernel, stride=stride,
                               apply_in_bn=apply_in_bn)
    return pl.pallas_call(
        kernel,
        grid=(n_ct, n),
        in_specs=[
            pl.BlockSpec((1, cin), lambda j, i: (0, 0)),            # scale
            pl.BlockSpec((1, cin), lambda j, i: (0, 0)),            # shift
            pl.BlockSpec((1, h, w, cin), lambda j, i: (i, 0, 0, 0)),  # x
            pl.BlockSpec((9 * cin, cout_t), lambda j, i: (0, j)),   # weight
        ],
        out_specs=[
            pl.BlockSpec((1, oh, ow, cout_t), lambda j, i: (i, 0, 0, j)),
            pl.BlockSpec((1, cout_t), lambda j, i: (0, j)),         # sum
            pl.BlockSpec((1, cout_t), lambda j, i: (0, j)),         # sumsq
        ],
        out_shape=(
            jax.ShapeDtypeStruct((n, oh, ow, cout), x.dtype),
            jax.ShapeDtypeStruct((1, cout), jnp.float32),
            jax.ShapeDtypeStruct((1, cout), jnp.float32),
        ),
        scratch_shapes=[pltpu.VMEM((h + 2, w + 2, cin), x.dtype)],
        compiler_params=pltpu.CompilerParams(
            dimension_semantics=("parallel", "arbitrary")),
    )(scale_in, shift_in, x, w2d)


# --------------------------------------------------------------------------
# Kernel 2: elementwise BN (precomputed scale/shift) + ReLU epilogue.
# Operates on the (N, H, W*C) view so the output lane dim is W*C (lane-dense
# stores); scale/shift are pre-tiled per-W in the wrapper.
# --------------------------------------------------------------------------
def _bn_relu_kernel(scale_ref, shift_ref, x_ref, o_ref):
    x = x_ref[...].astype(jnp.float32)
    y = jnp.maximum(x * scale_ref[...] + shift_ref[...], 0.0)
    o_ref[...] = y.astype(o_ref.dtype)


def _bn_relu(x, scale, shift):
    n, h, w, c = x.shape
    wc = w * c
    x_flat = x.reshape(n, h, wc)                       # contiguous, free view
    scale_t = jnp.tile(scale.astype(jnp.float32), (1, w))   # (1, W*C)
    shift_t = jnp.tile(shift.astype(jnp.float32), (1, w))
    out_flat = pl.pallas_call(
        _bn_relu_kernel,
        grid=(n,),
        in_specs=[
            pl.BlockSpec((1, wc), lambda i: (0, 0)),
            pl.BlockSpec((1, wc), lambda i: (0, 0)),
            pl.BlockSpec((1, h, wc), lambda i: (i, 0, 0)),
        ],
        out_specs=pl.BlockSpec((1, h, wc), lambda i: (i, 0, 0)),
        out_shape=jax.ShapeDtypeStruct((n, h, wc), x.dtype),
        compiler_params=pltpu.CompilerParams(
            dimension_semantics=("parallel",)),
    )(scale_t, shift_t, x_flat)
    return out_flat.reshape(n, h, w, c)


def _finalize_stats(s, sq, gamma, beta, count, eps):
    """Turn (sum, sum_sq) into per-channel BN scale/shift (training-mode)."""
    mean = s / count
    var = jnp.maximum(sq / count - mean * mean, 0.0)
    scale = gamma.reshape(1, -1).astype(jnp.float32) * jax.lax.rsqrt(var + eps)
    shift = beta.reshape(1, -1).astype(jnp.float32) - mean * scale
    return scale, shift


def basic_block_noshortcut(x_nhwc, params, *, stride=1, eps=1e-5):
    # TODO(synk): running_mean / running_var buffer updates (a BatchNorm
    # training side effect) are not modeled; forward() output is unaffected.
    n, h, w, cin = x_nhwc.shape
    cout1 = params["w1"].shape[-1]
    cout2 = params["w2"].shape[-1]
    w1_2d = params["w1"].reshape(9 * cin, cout1)
    w2_2d = params["w2"].reshape(9 * cout1, cout2)

    ones = jnp.ones((1, cin), jnp.float32)
    zeros = jnp.zeros((1, cin), jnp.float32)

    # Stage 1: conv1 (raw) + BN1 partial stats.
    conv1, s1, sq1 = _conv_stats(x_nhwc, w1_2d, ones, zeros,
                                 stride=stride, apply_in_bn=False, cout=cout1)
    oh, ow = conv1.shape[1], conv1.shape[2]
    scale1, shift1 = _finalize_stats(s1, sq1, params["g1"], params["b1"],
                                     n * oh * ow, eps)

    # Stage 2: fused bn1+relu1 (on the fly) + conv2 (raw) + BN2 partial stats.
    conv2, s2, sq2 = _conv_stats(conv1, w2_2d, scale1, shift1,
                                 stride=1, apply_in_bn=True, cout=cout2)
    scale2, shift2 = _finalize_stats(s2, sq2, params["g2"], params["b2"],
                                     n * oh * ow, eps)

    # Final bn2 + relu2 epilogue (lane-dense).
    return _bn_relu(conv2, scale2, shift2)


# ------------------------- plain-JAX reference (NCHW) -------------------------
def _ref_block(x_nchw, params, stride, eps=1e-5):
    def conv(x, w_oihw, s):
        return jax.lax.conv_general_dilated(
            x, w_oihw, window_strides=(s, s), padding=((1, 1), (1, 1)),
            dimension_numbers=("NCHW", "OIHW", "NCHW"))

    def bn(x, g, b):
        mean = jnp.mean(x, axis=(0, 2, 3), keepdims=True)
        var = jnp.mean(jnp.square(x - mean), axis=(0, 2, 3), keepdims=True)
        return (x - mean) / jnp.sqrt(var + eps) * g.reshape(1, -1, 1, 1) \
            + b.reshape(1, -1, 1, 1)

    out = jax.nn.relu(bn(conv(x_nchw, params["w1_oihw"], stride),
                         params["g1"], params["b1"]))
    out = jax.nn.relu(bn(conv(out, params["w2_oihw"], 1),
                         params["g2"], params["b2"]))
    return out


if __name__ == "__main__":
    # Small shapes: batch=2, in_planes=4, planes=8, spatial=16x16, stride=1.
    N, IN_PLANES, PLANES, H, W = 2, 4, 8, 16, 16
    STRIDE = 1

    key = jax.random.PRNGKey(0)
    kx, kw1, kw2, kg1, kb1, kg2, kb2 = jax.random.split(key, 7)

    x_nchw = jax.random.normal(kx, (N, IN_PLANES, H, W), jnp.float32)

    # Conv weights in PyTorch OIHW layout (synthetic deterministic init).
    w1_oihw = jax.random.normal(kw1, (PLANES, IN_PLANES, 3, 3), jnp.float32) * 0.1
    w2_oihw = jax.random.normal(kw2, (PLANES, PLANES, 3, 3), jnp.float32) * 0.1
    g1 = 1.0 + 0.1 * jax.random.normal(kg1, (PLANES,), jnp.float32)
    b1 = 0.1 * jax.random.normal(kb1, (PLANES,), jnp.float32)
    g2 = 1.0 + 0.1 * jax.random.normal(kg2, (PLANES,), jnp.float32)
    b2 = 0.1 * jax.random.normal(kb2, (PLANES,), jnp.float32)

    params = dict(
        w1=jnp.transpose(w1_oihw, (2, 3, 1, 0)),  # (KH, KW, Cin, Cout)
        w2=jnp.transpose(w2_oihw, (2, 3, 1, 0)),
        g1=g1, b1=b1, g2=g2, b2=b2,
        w1_oihw=w1_oihw, w2_oihw=w2_oihw,
    )

    x_nhwc = jnp.transpose(x_nchw, (0, 2, 3, 1))
    out_nhwc = basic_block_noshortcut(x_nhwc, params, stride=STRIDE)
    out_nhwc = jax.block_until_ready(out_nhwc)
    out_nchw = jnp.transpose(out_nhwc, (0, 3, 1, 2))

    ref = _ref_block(x_nchw, params, STRIDE)
    assert out_nchw.shape == ref.shape, (out_nchw.shape, ref.shape)
    assert jnp.allclose(out_nchw, ref, atol=2e-4, rtol=2e-4), \
        float(jnp.max(jnp.abs(out_nchw - ref)))

    print("KERNEL_OK")
</pallas_src>

<mosaic_0001>
module attributes {stable_mosaic.version = 11 : i64} {
  func.func @_conv_stats_kernel(%arg0: i32, %arg1: i32, %arg2: memref<1x4xf32, #tpu.memory_space<vmem>>, %arg3: memref<1x4xf32, #tpu.memory_space<vmem>>, %arg4: memref<1x16x16x4xf32, #tpu.memory_space<vmem>>, %arg5: memref<36x8xf32, #tpu.memory_space<vmem>>, %arg6: memref<1x16x16x8xf32, #tpu.memory_space<vmem>>, %arg7: memref<1x8xf32, #tpu.memory_space<vmem>>, %arg8: memref<1x8xf32, #tpu.memory_space<vmem>>, %arg9: memref<18x18x4xf32, #tpu.memory_space<vmem>>) attributes {dimension_semantics = [#tpu.dimension_semantics<parallel>, #tpu.dimension_semantics<arbitrary>], iteration_bounds = array<i64: 1, 2>, scalar_prefetch = 0 : i64, scratch_operands = 1 : i64, tpu.core_type = #tpu.core_type<tc>, window_params = [{pipeline_mode = #tpu.pipeline_mode<synchronous>, transform_indices = @transform_0, window_bounds = array<i64: 1, 4>}, {pipeline_mode = #tpu.pipeline_mode<synchronous>, transform_indices = @transform_1, window_bounds = array<i64: 1, 4>}, {transform_indices = @transform_2, window_bounds = array<i64: 1, 16, 16, 4>}, {transform_indices = @transform_3, window_bounds = array<i64: 36, 8>}, {transform_indices = @transform_4, window_bounds = array<i64: 1, 16, 16, 8>}, {transform_indices = @transform_5, window_bounds = array<i64: 1, 8>}, {transform_indices = @transform_6, window_bounds = array<i64: 1, 8>}]} {
    %c0_i32 = arith.constant 0 : i32
    %0 = arith.cmpi eq, %arg1, %c0_i32 : i32
    %1 = arith.extui %0 : i1 to i32
    %c0_i32_0 = arith.constant 0 : i32
    %2 = arith.cmpi ne, %1, %c0_i32_0 : i32
    scf.if %2 {
      %cst_48 = arith.constant 0.000000e+00 : f32
      %32 = vector.broadcast %cst_48 : f32 to vector<18x18x4xf32>
      %c0_49 = arith.constant 0 : index
      %c0_50 = arith.constant 0 : index
      %c0_51 = arith.constant 0 : index
      %33 = vector.load %arg9[%c0_49, %c0_50, %c0_51] : memref<18x18x4xf32, #tpu.memory_space<vmem>>, vector<18x18x4xf32>
      tpu.vector_store %arg9[%c0_49, %c0_50, %c0_51], %32 {strides = array<i32>} : memref<18x18x4xf32, #tpu.memory_space<vmem>>, vector<18x18x4xf32>,
      %cst_52 = arith.constant 0.000000e+00 : f32
      %34 = vector.broadcast %cst_52 : f32 to vector<1x8xf32>
      %c0_53 = arith.constant 0 : index
      %c0_54 = arith.constant 0 : index
      %35 = vector.load %arg7[%c0_53, %c0_54] : memref<1x8xf32, #tpu.memory_space<vmem>>, vector<1x8xf32>
      tpu.vector_store %arg7[%c0_53, %c0_54], %34 {strides = array<i32>} : memref<1x8xf32, #tpu.memory_space<vmem>>, vector<1x8xf32>,
      %cst_55 = arith.constant 0.000000e+00 : f32
      %36 = vector.broadcast %cst_55 : f32 to vector<1x8xf32>
      %c0_56 = arith.constant 0 : index
      %c0_57 = arith.constant 0 : index
      %37 = vector.load %arg8[%c0_56, %c0_57] : memref<1x8xf32, #tpu.memory_space<vmem>>, vector<1x8xf32>
      tpu.vector_store %arg8[%c0_56, %c0_57], %36 {strides = array<i32>} : memref<1x8xf32, #tpu.memory_space<vmem>>, vector<1x8xf32>,
    } else {
    }
    %c0 = arith.constant 0 : index
    %c0_1 = arith.constant 0 : index
    %c0_2 = arith.constant 0 : index
    %c0_3 = arith.constant 0 : index
    %3 = vector.load %arg4[%c0, %c0_1, %c0_2, %c0_3] : memref<1x16x16x4xf32, #tpu.memory_space<vmem>>, vector<1x16x16x4xf32>
    %4 = vector.shape_cast %3 : vector<1x16x16x4xf32> to vector<16x16x4xf32>
    %c1 = arith.constant 1 : index
    %c1_4 = arith.constant 1 : index
    %c0_5 = arith.constant 0 : index
    %5 = vector.load %arg9[%c1, %c1_4, %c0_5] : memref<18x18x4xf32, #tpu.memory_space<vmem>>, vector<16x16x4xf32>
    tpu.vector_store %arg9[%c1, %c1_4, %c0_5], %4 {strides = array<i32>} : memref<18x18x4xf32, #tpu.memory_space<vmem>>, vector<16x16x4xf32>,
    %c0_6 = arith.constant 0 : index
    %c0_7 = arith.constant 0 : index
    %c0_8 = arith.constant 0 : index
    %6 = vector.load %arg9[%c0_6, %c0_7, %c0_8] : memref<18x18x4xf32, #tpu.memory_space<vmem>>, vector<16x16x4xf32>
    %c0_9 = arith.constant 0 : index
    %c1_10 = arith.constant 1 : index
    %c0_11 = arith.constant 0 : index
    %7 = vector.load %arg9[%c0_9, %c1_10, %c0_11] : memref<18x18x4xf32, #tpu.memory_space<vmem>>, vector<16x16x4xf32>
    %c0_12 = arith.constant 0 : index
    %c2 = arith.constant 2 : index
    %c0_13 = arith.constant 0 : index
    %8 = vector.load %arg9[%c0_12, %c2, %c0_13] : memref<18x18x4xf32, #tpu.memory_space<vmem>>, vector<16x16x4xf32>
    %c1_14 = arith.constant 1 : index
    %c0_15 = arith.constant 0 : index
    %c0_16 = arith.constant 0 : index
    %9 = vector.load %arg9[%c1_14, %c0_15, %c0_16] : memref<18x18x4xf32, #tpu.memory_space<vmem>>, vector<16x16x4xf32>
    %c1_17 = arith.constant 1 : index
    %c1_18 = arith.constant 1 : index
    %c0_19 = arith.constant 0 : index
    %10 = vector.load %arg9[%c1_17, %c1_18, %c0_19] : memref<18x18x4xf32, #tpu.memory_space<vmem>>, vector<16x16x4xf32>
    %c1_20 = arith.constant 1 : index
    %c2_21 = arith.constant 2 : index
    %c0_22 = arith.constant 0 : index
    %11 = vector.load %arg9[%c1_20, %c2_21, %c0_22] : memref<18x18x4xf32, #tpu.memory_space<vmem>>, vector<16x16x4xf32>
    %c2_23 = arith.constant 2 : index
    %c0_24 = arith.constant 0 : index
    %c0_25 = arith.constant 0 : index
    %12 = vector.load %arg9[%c2_23, %c0_24, %c0_25] : memref<18x18x4xf32, #tpu.memory_space<vmem>>, vector<16x16x4xf32>
    %c2_26 = arith.constant 2 : index
    %c1_27 = arith.constant 1 : index
    %c0_28 = arith.constant 0 : index
    %13 = vector.load %arg9[%c2_26, %c1_27, %c0_28] : memref<18x18x4xf32, #tpu.memory_space<vmem>>, vector<16x16x4xf32>
    %c2_29 = arith.constant 2 : index
    %c2_30 = arith.constant 2 : index
    %c0_31 = arith.constant 0 : index
    %14 = vector.load %arg9[%c2_29, %c2_30, %c0_31] : memref<18x18x4xf32, #tpu.memory_space<vmem>>, vector<16x16x4xf32>
    %15 = tpu.concatenate %6, %7, %8, %9, %10, %11, %12, %13, %14 in 2 : vector<16x16x4xf32>, vector<16x16x4xf32>, vector<16x16x4xf32>, vector<16x16x4xf32>, vector<16x16x4xf32>, vector<16x16x4xf32>, vector<16x16x4xf32>, vector<16x16x4xf32>, vector<16x16x4xf32> -> vector<16x16x36xf32>
    %16 = vector.shape_cast %15 : vector<16x16x36xf32> to vector<256x36xf32>
    %c0_32 = arith.constant 0 : index
    %c0_33 = arith.constant 0 : index
    %17 = vector.load %arg5[%c0_32, %c0_33] : memref<36x8xf32, #tpu.memory_space<vmem>>, vector<36x8xf32>
    %cst = arith.constant dense<0.000000e+00> : vector<256x8xf32>
    %18 = tpu.matmul %16, %17, %cst {dimension_numbers = #tpu.dot_dimension_numbers<[1], [0], [0], [1], [0, 0, 1, 1], [], []>} : vector<256x36xf32>, vector<36x8xf32>, vector<256x8xf32> -> vector<256x8xf32>
    %19 = vector.shape_cast %18 : vector<256x8xf32> to vector<1x16x16x8xf32>
    %c0_34 = arith.constant 0 : index
    %c0_35 = arith.constant 0 : index
    %c0_36 = arith.constant 0 : index
    %c0_37 = arith.constant 0 : index
    %20 = vector.load %arg6[%c0_34, %c0_35, %c0_36, %c0_37] : memref<1x16x16x8xf32, #tpu.memory_space<vmem>>, vector<1x16x16x8xf32>
    tpu.vector_store %arg6[%c0_34, %c0_35, %c0_36, %c0_37], %19 {strides = array<i32>} : memref<1x16x16x8xf32, #tpu.memory_space<vmem>>, vector<1x16x16x8xf32>,
    %c0_38 = arith.constant 0 : index
    %c0_39 = arith.constant 0 : index
    %21 = vector.load %arg7[%c0_38, %c0_39] : memref<1x8xf32, #tpu.memory_space<vmem>>, vector<1x8xf32>
    %cst_40 = arith.constant dense<0.000000e+00> : vector<8xf32>
    %22 = vector.multi_reduction <add>, %18, %cst_40 [0] : vector<256x8xf32> to vector<8xf32>
    %23 = vector.shape_cast %22 : vector<8xf32> to vector<1x8xf32>
    %24 = arith.addf %21, %23 : vector<1x8xf32>
    %c0_41 = arith.constant 0 : index
    %c0_42 = arith.constant 0 : index
    %25 = vector.load %arg7[%c0_41, %c0_42] : memref<1x8xf32, #tpu.memory_space<vmem>>, vector<1x8xf32>
    tpu.vector_store %arg7[%c0_41, %c0_42], %24 {strides = array<i32>} : memref<1x8xf32, #tpu.memory_space<vmem>>, vector<1x8xf32>,
    %c0_43 = arith.constant 0 : index
    %c0_44 = arith.constant 0 : index
    %26 = vector.load %arg8[%c0_43, %c0_44] : memref<1x8xf32, #tpu.memory_space<vmem>>, vector<1x8xf32>
    %27 = arith.mulf %18, %18 : vector<256x8xf32>
    %cst_45 = arith.constant dense<0.000000e+00> : vector<8xf32>
    %28 = vector.multi_reduction <add>, %27, %cst_45 [0] : vector<256x8xf32> to vector<8xf32>
    %29 = vector.shape_cast %28 : vector<8xf32> to vector<1x8xf32>
    %30 = arith.addf %26, %29 : vector<1x8xf32>
    %c0_46 = arith.constant 0 : index
    %c0_47 = arith.constant 0 : index
    %31 = vector.load %arg8[%c0_46, %c0_47] : memref<1x8xf32, #tpu.memory_space<vmem>>, vector<1x8xf32>
    tpu.vector_store %arg8[%c0_46, %c0_47], %30 {strides = array<i32>} : memref<1x8xf32, #tpu.memory_space<vmem>>, vector<1x8xf32>,
    return
  }
  func.func @transform_0(%arg0: i32, %arg1: i32) -> (i32, i32) {
    %c0_i32 = arith.constant 0 : i32
    %c0_i32_0 = arith.constant 0 : i32
    %c0_i32_1 = arith.constant 0 : i32
    return %c0_i32, %c0_i32_0 : i32, i32
  }
  func.func @transform_1(%arg0: i32, %arg1: i32) -> (i32, i32) {
    %c0_i32 = arith.constant 0 : i32
    %c0_i32_0 = arith.constant 0 : i32
    %c0_i32_1 = arith.constant 0 : i32
    return %c0_i32, %c0_i32_0 : i32, i32
  }
  func.func @transform_2(%arg0: i32, %arg1: i32) -> (i32, i32, i32, i32) {
    %c0_i32 = arith.constant 0 : i32
    %c0_i32_0 = arith.constant 0 : i32
    %c0_i32_1 = arith.constant 0 : i32
    %c0_i32_2 = arith.constant 0 : i32
    return %arg1, %c0_i32, %c0_i32_0, %c0_i32_1 : i32, i32, i32, i32
  }
  func.func @transform_3(%arg0: i32, %arg1: i32) -> (i32, i32) {
    %c0_i32 = arith.constant 0 : i32
    %c0_i32_0 = arith.constant 0 : i32
    return %c0_i32, %arg0 : i32, i32
  }
  func.func @transform_4(%arg0: i32, %arg1: i32) -> (i32, i32, i32, i32) {
    %c0_i32 = arith.constant 0 : i32
    %c0_i32_0 = arith.constant 0 : i32
    %c0_i32_1 = arith.constant 0 : i32
    return %arg1, %c0_i32, %c0_i32_0, %arg0 : i32, i32, i32, i32
  }
  func.func @transform_5(%arg0: i32, %arg1: i32) -> (i32, i32) {
    %c0_i32 = arith.constant 0 : i32
    %c0_i32_0 = arith.constant 0 : i32
    return %c0_i32, %arg0 : i32, i32
  }
  func.func @transform_6(%arg0: i32, %arg1: i32) -> (i32, i32) {
    %c0_i32 = arith.constant 0 : i32
    %c0_i32_0 = arith.constant 0 : i32
    return %c0_i32, %arg0 : i32, i32
  }
}

</mosaic_0001>

<bundles_post_ra>
// kernel: tpu_custom_call.1
= control target key start
LH: loop header
LB: loop body
LE: loop exit
PB: predicated region body
PF: predicated region fallthrough
CT: control target
= control target key end

     0   :  { %12 = vsyncpa [#allocation4], 0  ;;  %s4455_s0 = inlined_call_operand.vmem [shape: f32[1,4], index: 0, kind: input, shape index: {}]   ;;  %s4456_s1 = inlined_call_operand.vmem [shape: f32[1,4], index: 1, kind: input, shape index: {}]   ;;  %s4457_s2 = inlined_call_operand.vmem [shape: f32[2,16,16,4], index: 2, kind: input, shape index: {}]   ;;  %s4458_s3 = inlined_call_operand.vmem [shape: f32[36,8], index: 3, kind: input, shape index: {}]   ;;  %s4459_s4 = inlined_call_operand.vmem [shape: f32[2,16,16,8], index: 4, kind: output, shape index: {0}]   ;;  %s4460_s5 = inlined_call_operand.hbm [shape: f32[1,8], index: 5, kind: output, shape index: {1}]   ;;  %s4461_s6 = inlined_call_operand.hbm [shape: f32[1,8], index: 6, kind: output, shape index: {2}]  }
   0x1   :  { %13 = vsyncpa [#allocation6], 0  ;;  %s3026_s0 = smov 0   ;;  %s3028_s1 = smov 0  }
   0x2   :  { %s3030_s21 = smov 0  }
   0x3 LB: > { %s2688_s22 = sadd.s32 4294967295, %s2978_s21   ;;  %s28_s23 = sadd.s32 1, %s2974_s1  ;;  %s2978_s21 = sphi %s3030_s21, %s19_s21   ;;  %s2974_s1 = sphi %s3028_s1, %s4563_s1   ;;  %s2970_s0 = sphi %s3026_s0, %s4562_s0  }
   0x4   : > { %p29_p0 = scmp.ge.s32.totalorder %s28_s23, 2  ;;  %p2693_p1 = scmp.ge.s32.totalorder %s2978_s21, 1 }
   0x5   : > { %p242_p2 = scmp.lt.s32.totalorder %s2978_s21, 3 }
   0x6   : > { %s4565_s23 = smov (%p29_p0, %s28_s23), 0 }
   0x7   : > { %p243_p3 = pnand %p2693_p1, %p242_p2 }
   0x9   : > { %246 = sbr.rel (%p243_p3) target bundleno = 954 (0x3ba), region = 36 }
  0x10   : > { %p279_p4 = scmp.lt.s32.totalorder %s2970_s0, 1  ;;  %p2698_p5 = scmp.ne.s32.totalorder %s2970_s0, 0 }
  0x11   : > { %vm300_vm0 = vcmask (!%p2698_p5), 31744   ;;  %vm303_vm1 = vcmask (!%p2698_p5), 25600   ;;  %vm356_vm2 = vcmask (!%p2698_p5), 57344   ;;  %v2980_v0 = vmov (!%p2698_p5), 0.0  }
  0x12   : > { %s280_s24 = scalar_select %p279_p4, %s2970_s0, 1 }
  0x13   : > { %299 = sbr.rel (%p2698_p5) target bundleno = 47 (0x2f), region = 40  ;;  %301 = vst.msk [vmem:[#allocation2] sm:$0xff] (!%p2698_p5), %vm300_vm0, %v2980_v0  ;;  %302 = vst.msk [vmem:[#allocation2 + $0x8] sm:$0xff] (!%p2698_p5), %vm300_vm0, %v2980_v0 }
  0x14   : > { %s2738_s25 = sshll.u32 %s280_s24, 8  ;;  %305 = vst.msk [vmem:[#allocation2 + $0x18] sm:$0xff] (!%p2698_p5), %vm300_vm0, %v2980_v0  ;;  %306 = vst.msk [vmem:[#allocation2 + $0x20] sm:$0xff] (!%p2698_p5), %vm300_vm0, %v2980_v0 }
  0x15   : > { %s3048_s28 = scalar_lea.vmem %s4457_s2, %s2738_s25  ;;  %s3053_s7 = scalar_lea.vmem %s4459_s4, %s2738_s25  ;;  %308 = vst.msk [vmem:[#allocation2 + $0x30] sm:$0xff] (!%p2698_p5), %vm300_vm0, %v2980_v0  ;;  %309 = vst.msk [vmem:[#allocation2 + $0x38] sm:$0xff] (!%p2698_p5), %vm300_vm0, %v2980_v0 }
  0x16   : > { %311 = vst.msk [vmem:[#allocation2 + $0x48] sm:$0xff] (!%p2698_p5), %vm300_vm0, %v2980_v0  ;;  %312 = vst.msk [vmem:[#allocation2 + $0x50] sm:$0xff] (!%p2698_p5), %vm300_vm0, %v2980_v0 }
  0x17   : > { %314 = vst.msk [vmem:[#allocation2 + $0x60] sm:$0xff] (!%p2698_p5), %vm300_vm0, %v2980_v0  ;;  %315 = vst.msk [vmem:[#allocation2 + $0x68] sm:$0xff] (!%p2698_p5), %vm300_vm0, %v2980_v0 }
  0x18   : > { %317 = vst.msk [vmem:[#allocation2 + $0x78] sm:$0xff] (!%p2698_p5), %vm300_vm0, %v2980_v0  ;;  %318 = vst.msk [vmem:[#allocation2 + $0x80] sm:$0xff] (!%p2698_p5), %vm300_vm0, %v2980_v0 }
  0x19   : > { %320 = vst.msk [vmem:[#allocation2 + $0x90] sm:$0xff] (!%p2698_p5), %vm300_vm0, %v2980_v0  ;;  %321 = vst.msk [vmem:[#allocation2 + $0x98] sm:$0xff] (!%p2698_p5), %vm300_vm0, %v2980_v0 }
  0x1a   : > { %323 = vst.msk [vmem:[#allocation2 + $0xa8] sm:$0xff] %vm300_vm0, %v2980_v0  ;;  %324 = vst.msk [vmem:[#allocation2 + $0xb0] sm:$0xff] %vm300_vm0, %v2980_v0 }
  0x1b   : > { %326 = vst.msk [vmem:[#allocation2 + $0xc0] sm:$0xff] %vm300_vm0, %v2980_v0  ;;  %327 = vst.msk [vmem:[#allocation2 + $0xc8] sm:$0xff] %vm300_vm0, %v2980_v0 }
  0x1c   : > { %329 = vst.msk [vmem:[#allocation2 + $0xd8] sm:$0xff] %vm300_vm0, %v2980_v0  ;;  %330 = vst.msk [vmem:[#allocation2 + $0xe0] sm:$0xff] %vm300_vm0, %v2980_v0 }
  0x1d   : > { %332 = vst.msk [vmem:[#allocation2 + $0xf0] sm:$0xff] %vm300_vm0, %v2980_v0  ;;  %333 = vst.msk [vmem:[#allocation2 + $0xf8] sm:$0xff] %vm300_vm0, %v2980_v0 }
  0x1e   : > { %335 = vst.msk [vmem:[#allocation2 + $0x108] sm:$0xff] %vm300_vm0, %v2980_v0  ;;  %336 = vst.msk [vmem:[#allocation2 + $0x110] sm:$0xff] %vm300_vm0, %v2980_v0 }
  0x1f   : > { %338 = vst.msk [vmem:[#allocation2 + $0x120] sm:$0xff] %vm300_vm0, %v2980_v0  ;;  %339 = vst.msk [vmem:[#allocation2 + $0x128] sm:$0xff] %vm300_vm0, %v2980_v0 }
  0x20   : > { %341 = vst.msk [vmem:[#allocation2 + $0x138] sm:$0xff] %vm300_vm0, %v2980_v0  ;;  %342 = vst.msk [vmem:[#allocation2 + $0x140] sm:$0xff] %vm300_vm0, %v2980_v0 }
  0x21   : > { %344 = vst.msk [vmem:[#allocation2 + $0x150] sm:$0xff] %vm300_vm0, %v2980_v0  ;;  %345 = vst.msk [vmem:[#allocation2 + $0x158] sm:$0xff] %vm300_vm0, %v2980_v0 }
  0x22   : > { %347 = vst.msk [vmem:[#allocation2 + $0x168] sm:$0xff] %vm300_vm0, %v2980_v0  ;;  %348 = vst.msk [vmem:[#allocation2 + $0x170] sm:$0xff] %vm300_vm0, %v2980_v0 }
  0x23   : > { %350 = vst.msk [vmem:[#allocation2 + $0x180] sm:$0xff] %vm300_vm0, %v2980_v0  ;;  %351 = vst.msk [vmem:[#allocation2 + $0x188] sm:$0xff] %vm300_vm0, %v2980_v0 }
  0x24   : > { %353 = vst.msk [vmem:[#allocation2 + $0x198] sm:$0xff] %vm300_vm0, %v2980_v0  ;;  %354 = vst.msk [vmem:[#allocation2 + $0x1a0] sm:$0xff] %vm300_vm0, %v2980_v0 }
  0x25   : > { %304 = vst.msk [vmem:[#allocation2 + $0x10] sm:$0x3] %vm303_vm1, %v2980_v0  ;;  %307 = vst.msk [vmem:[#allocation2 + $0x28] sm:$0x3] %vm303_vm1, %v2980_v0 }
  0x26   : > { %310 = vst.msk [vmem:[#allocation2 + $0x40] sm:$0x3] %vm303_vm1, %v2980_v0  ;;  %313 = vst.msk [vmem:[#allocation2 + $0x58] sm:$0x3] %vm303_vm1, %v2980_v0 }
  0x27   : > { %316 = vst.msk [vmem:[#allocation2 + $0x70] sm:$0x3] %vm303_vm1, %v2980_v0  ;;  %319 = vst.msk [vmem:[#allocation2 + $0x88] sm:$0x3] %vm303_vm1, %v2980_v0 }
  0x28   : > { %322 = vst.msk [vmem:[#allocation2 + $0xa0] sm:$0x3] %vm303_vm1, %v2980_v0  ;;  %325 = vst.msk [vmem:[#allocation2 + $0xb8] sm:$0x3] %vm303_vm1, %v2980_v0 }
  0x29   : > { %328 = vst.msk [vmem:[#allocation2 + $0xd0] sm:$0x3] %vm303_vm1, %v2980_v0  ;;  %331 = vst.msk [vmem:[#allocation2 + $0xe8] sm:$0x3] %vm303_vm1, %v2980_v0 }
  0x2a   : > { %334 = vst.msk [vmem:[#allocation2 + $0x100] sm:$0x3] %vm303_vm1, %v2980_v0  ;;  %337 = vst.msk [vmem:[#allocation2 + $0x118] sm:$0x3] %vm303_vm1, %v2980_v0 }
  0x2b   : > { %340 = vst.msk [vmem:[#allocation2 + $0x130] sm:$0x3] %vm303_vm1, %v2980_v0  ;;  %343 = vst.msk [vmem:[#allocation2 + $0x148] sm:$0x3] %vm303_vm1, %v2980_v0 }
  0x2c   : > { %346 = vst.msk [vmem:[#allocation2 + $0x160] sm:$0x3] %vm303_vm1, %v2980_v0  ;;  %349 = vst.msk [vmem:[#allocation2 + $0x178] sm:$0x3] %vm303_vm1, %v2980_v0 }
  0x2d   : > { %352 = vst.msk [vmem:[#allocation2 + $0x190] sm:$0x3] %vm303_vm1, %v2980_v0  ;;  %355 = vst.msk [vmem:[#allocation2 + $0x1a8] sm:$0x3] %vm303_vm1, %v2980_v0 }
  0x2e   : > { %357 = vst.msk [vmem:[#allocation3] sm:$0x1] %vm356_vm2, %v2980_v0  ;;  %358 = vst.msk [vmem:[#allocation5] sm:$0x1] %vm356_vm2, %v2980_v0 }
  0x2f PF: > { %v457_v1 = vld [vmem:[#allocation2 + $0x1] sm:$0xff]  ;;  %v458_v2 = vld [vmem:[#allocation2 + $0x9] sm:$0xff]  ;;  %vm392_vm3 = vcmask 31744   ;;  %s2981_s8 = smov 4   ;;  %v362_v8 = vld [vmem:[%s3048_s28 + $0x18] sm:$0xff]  ;;  %s2982_s9 = smov 8  }
  0x30   : > { %v361_v3 = vld [vmem:[%s3048_s28 + $0x10] sm:$0xff]  ;;  %746 = vrot.lane.b32.xlu0 %v457_v1, %s2981_s8  ;;  %v359_v4 = vld [vmem:[%s3048_s28] sm:$0xff]  ;;  %v360_v6 = vld [vmem:[%s3048_s28 + $0x8] sm:$0xff]  ;;  %396 = vst.msk [vmem:[#allocation2 + $0x39] sm:$0xff] %vm392_vm3, %v362_v8  ;;  %s2983_s10 = smov 12   ;;  %s2984_s11 = smov 16  }
  0x31   : > { %395 = vst.msk [vmem:[#allocation2 + $0x31] sm:$0xff] %vm392_vm3, %v361_v3  ;;  %v363_v5 = vld [vmem:[%s3048_s28 + $0x20] sm:$0xff]  ;;  %393 = vst.msk [vmem:[#allocation2 + $0x19] sm:$0xff] %vm392_vm3, %v359_v4  ;;  %v365_v7 = vld [vmem:[%s3048_s28 + $0x30] sm:$0xff]  ;;  %s2985_s12 = smov 20   ;;  %s2986_s17 = smov 24  }
  0x32   : > { %397 = vst.msk [vmem:[#allocation2 + $0x49] sm:$0xff] %vm392_vm3, %v363_v5  ;;  %394 = vst.msk [vmem:[#allocation2 + $0x21] sm:$0xff] %vm392_vm3, %v360_v6  ;;  %v367_v9 = vld [vmem:[%s3048_s28 + $0x40] sm:$0xff]  ;;  %v364_v10 = vld [vmem:[%s3048_s28 + $0x28] sm:$0xff]  ;;  %vm2103_vm4 = vcmask 1043456   ;;  %s2987_s26 = smov 32  }
  0x33   : > { %399 = vst.msk [vmem:[#allocation2 + $0x61] sm:$0xff] %vm392_vm3, %v365_v7  ;;  %401 = vst.msk [vmem:[#allocation2 + $0x79] sm:$0xff] %vm392_vm3, %v367_v9  ;;  %v369_v11 = vld [vmem:[%s3048_s28 + $0x50] sm:$0xff]  ;;  %v366_v12 = vld [vmem:[%s3048_s28 + $0x38] sm:$0xff]  ;;  %s2988_s27 = smov 28   ;;  %vm1770_vm5 = vcmask 64512  }
  0x34   : > { %398 = vst.msk [vmem:[#allocation2 + $0x51] sm:$0xff] %vm392_vm3, %v364_v10  ;;  %403 = vst.msk [vmem:[#allocation2 + $0x91] sm:$0xff] %vm392_vm3, %v369_v11  ;;  %v371_v13 = vld [vmem:[%s3048_s28 + $0x60] sm:$0xff]  ;;  %v368_v14 = vld [vmem:[%s3048_s28 + $0x48] sm:$0xff]  ;;  %748 = vrot.lane.b32.xlu0 %v458_v2, %s2981_s8  ;;  %vm1803_vm6 = vcmask 97280   ;;  %vm1836_vm7 = vcmask 130048  }
  0x35   : > { %400 = vst.msk [vmem:[#allocation2 + $0x69] sm:$0xff] %vm392_vm3, %v366_v12  ;;  %v373_v15 = vld [vmem:[%s3048_s28 + $0x70] sm:$0xff]  ;;  %405 = vst.msk [vmem:[#allocation2 + $0xa9] sm:$0xff] %vm392_vm3, %v371_v13  ;;  %v370_v16 = vld [vmem:[%s3048_s28 + $0x58] sm:$0xff]  ;;  %vm1869_vm8 = vcmask 162816   ;;  %vm1935_vm9 = vcmask 228352  }
  0x36   : > { %402 = vst.msk [vmem:[#allocation2 + $0x81] sm:$0xff] %vm392_vm3, %v368_v14  ;;  %407 = vst.msk [vmem:[#allocation2 + $0xc1] sm:$0xff] %vm392_vm3, %v373_v15  ;;  %v375_v17 = vld [vmem:[%s3048_s28 + $0x80] sm:$0xff]  ;;  %v372_v18 = vld [vmem:[%s3048_s28 + $0x68] sm:$0xff]  ;;  %vm1902_vm10 = vcmask 195584   ;;  %vm1968_vm11 = vcmask 261120  }
  0x37   : > { %404 = vst.msk [vmem:[#allocation2 + $0x99] sm:$0xff] %vm392_vm3, %v370_v16  ;;  %409 = vst.msk [vmem:[#allocation2 + $0xd9] sm:$0xff] %vm392_vm3, %v375_v17  ;;  %v377_v19 = vld [vmem:[%s3048_s28 + $0x90] sm:$0xff]  ;;  %v374_v20 = vld [vmem:[%s3048_s28 + $0x78] sm:$0xff]  ;;  %vm2006_vm12 = vcmask 293888   ;;  %vm2435_vm13 = vcmask 57344  }
  0x38   : > { %406 = vst.msk [vmem:[#allocation2 + $0xb1] sm:$0xff] %vm392_vm3, %v372_v18  ;;  %v379_v21 = vld [vmem:[%s3048_s28 + $0xa0] sm:$0xff]  ;;  %411 = vst.msk [vmem:[#allocation2 + $0xf1] sm:$0xff] %vm392_vm3, %v377_v19  ;;  %v376_v22 = vld [vmem:[%s3048_s28 + $0x88] sm:$0xff]  ;;  %p4388_p6 = scmp.eq.s32.totalorder %s2688_s22, 1 }
  0x39   : > { %408 = vst.msk [vmem:[#allocation2 + $0xc9] sm:$0xff] %vm392_vm3, %v374_v20  ;;  %413 = vst.msk [vmem:[#allocation2 + $0x109] sm:$0xff] %vm392_vm3, %v379_v21  ;;  %v381_v23 = vld [vmem:[%s3048_s28 + $0xb0] sm:$0xff]  ;;  %v378_v24 = vld [vmem:[%s3048_s28 + $0x98] sm:$0xff] }
  0x3a   : > { %v3154_v25 = vld [vmem:[#allocation2 + $0x31] sm:$0xff]  ;;  %410 = vst.msk [vmem:[#allocation2 + $0xe1] sm:$0xff] %vm392_vm3, %v376_v22  ;;  %415 = vst.msk [vmem:[#allocation2 + $0x121] sm:$0xff] %vm392_vm3, %v381_v23  ;;  %v383_v26 = vld [vmem:[%s3048_s28 + $0xc0] sm:$0xff] }
  0x3b   : > { %412 = vst.msk [vmem:[#allocation2 + $0xf9] sm:$0xff] %vm392_vm3, %v378_v24  ;;  %v380_v27 = vld [vmem:[%s3048_s28 + $0xa8] sm:$0xff]  ;;  %754 = vrot.lane.b32.xlu0 %v3154_v25, %s2981_s8  ;;  %v3163_v28 = vld [vmem:[#allocation2 + $0x19] sm:$0xff]  ;;  %417 = vst.msk [vmem:[#allocation2 + $0x139] sm:$0xff] %vm392_vm3, %v383_v26 }
  0x3c   : > { %414 = vst.msk [vmem:[#allocation2 + $0x111] sm:$0xff] %vm392_vm3, %v380_v27  ;;  %750 = vrot.lane.b32.xlu1 %v3163_v28, %s2981_s8  ;;  %v3169_v29 = vld [vmem:[#allocation2 + $0x49] sm:$0xff]  ;;  %v3171_v30 = vld [vmem:[#allocation2 + $0x21] sm:$0xff]  ;;  %v3179_v32 = vld [vmem:[#allocation2 + $0x39] sm:$0xff] }
  0x3d   : > { %v3177_v31 = vld [vmem:[#allocation2 + $0x61] sm:$0xff]  ;;  %v385_v33 = vld [vmem:[%s3048_s28 + $0xd0] sm:$0xff]  ;;  %v382_v34 = vld [vmem:[%s3048_s28 + $0xb8] sm:$0xff] }
  0x3e   : > { %419 = vst.msk [vmem:[#allocation2 + $0x151] sm:$0xff] %vm392_vm3, %v385_v33  ;;  %v387_v35 = vld [vmem:[%s3048_s28 + $0xe0] sm:$0xff]  ;;  %v384_v36 = vld [vmem:[%s3048_s28 + $0xc8] sm:$0xff]  ;;  %416 = vst.msk [vmem:[#allocation2 + $0x129] sm:$0xff] %vm392_vm3, %v382_v34 }
  0x3f   : > { %758 = vrot.lane.b32.xlu0 %v3169_v29, %s2981_s8  ;;  %v3190_v37 = vld [vmem:[#allocation2 + $0x79] sm:$0xff]  ;;  %421 = vst.msk [vmem:[#allocation2 + $0x169] sm:$0xff] %vm392_vm3, %v387_v35  ;;  %418 = vst.msk [vmem:[#allocation2 + $0x141] sm:$0xff] %vm392_vm3, %v384_v36  ;;  %v3196_v39 = vld [vmem:[#allocation2 + $0x51] sm:$0xff] }
  0x40   : > { %752 = vrot.lane.b32.xlu1 %v3171_v30, %s2981_s8  ;;  %v386_v38 = vld [vmem:[%s3048_s28 + $0xd8] sm:$0xff]  ;;  %v388_v40 = vld [vmem:[%s3048_s28 + $0xe8] sm:$0xff] }
  0x41   : > { %420 = vst.msk [vmem:[#allocation2 + $0x159] sm:$0xff] %vm392_vm3, %v386_v38  ;;  %422 = vst.msk [vmem:[#allocation2 + $0x171] sm:$0xff] %vm392_vm3, %v388_v40  ;;  %v3205_v41 = vld [vmem:[#allocation2 + $0x91] sm:$0xff]  ;;  %v3207_v42 = vld [vmem:[#allocation2 + $0x69] sm:$0xff] }
  0x42   : > { %v3213_v43 = vld [vmem:[#allocation2 + $0xa9] sm:$0xff]  ;;  %v3215_v44 = vld [vmem:[#allocation2 + $0x81] sm:$0xff]  ;;  %v3221_v46 = vld [vmem:[#allocation2 + $0x99] sm:$0xff] }
  0x43   : > { %762 = vrot.lane.b32.xlu0 %v3177_v31, %s2981_s8  ;;  %v473_v45 = vld [vmem:[#allocation2 + $0xc1] sm:$0xff]  ;;  %v475_v47 = vld [vmem:[#allocation2 + $0xd9] sm:$0xff]  ;;  %v3226_v48 = vld [vmem:[#allocation2 + $0xb1] sm:$0xff] }
  0x44   : > { %756 = vrot.lane.b32.xlu1 %v3179_v32, %s2981_s8  ;;  %v477_v49 = vld [vmem:[#allocation2 + $0xf1] sm:$0xff]  ;;  %v474_v50 = vld [vmem:[#allocation2 + $0xc9] sm:$0xff]  ;;  %v476_v52 = vld [vmem:[#allocation2 + $0xe1] sm:$0xff] }
  0x45   : > { %v479_v51 = vld [vmem:[#allocation2 + $0x109] sm:$0xff]  ;;  %v481_v53 = vld [vmem:[#allocation2 + $0x121] sm:$0xff]  ;;  %v478_v54 = vld [vmem:[#allocation2 + $0xf9] sm:$0xff] }
  0x46   : > { %v483_v55 = vld [vmem:[#allocation2 + $0x139] sm:$0xff]  ;;  %v480_v56 = vld [vmem:[#allocation2 + $0x111] sm:$0xff]  ;;  %v482_v58 = vld [vmem:[#allocation2 + $0x129] sm:$0xff] }
  0x47   : > { %766 = vrot.lane.b32.xlu0 %v3190_v37, %s2981_s8  ;;  %v485_v57 = vld [vmem:[#allocation2 + $0x151] sm:$0xff]  ;;  %v487_v59 = vld [vmem:[#allocation2 + $0x169] sm:$0xff]  ;;  %v484_v60 = vld [vmem:[#allocation2 + $0x141] sm:$0xff] }
  0x48   : > { %760 = vrot.lane.b32.xlu1 %v3196_v39, %s2981_s8  ;;  %v489_v61 = vld [vmem:[#allocation2 + $0x2] sm:$0xff]  ;;  %v486_v62 = vld [vmem:[#allocation2 + $0x159] sm:$0xff]  ;;  %v488_v0 = vld [vmem:[#allocation2 + $0x171] sm:$0xff] }
  0x49   : > { %v3245_v63 = vld [vmem:[#allocation2 + $0x1a] sm:$0xff]  ;;  %v3250_v1 = vld [vmem:[#allocation2 + $0x32] sm:$0xff]  ;;  %v490_v2 = vld [vmem:[#allocation2 + $0xa] sm:$0xff] }
  0x4a   : > { %v3255_v3 = vld [vmem:[#allocation2 + $0x4a] sm:$0xff]  ;;  %v3257_v4 = vld [vmem:[#allocation2 + $0x22] sm:$0xff]  ;;  %v3265_v6 = vld [vmem:[#allocation2 + $0x3a] sm:$0xff] }
  0x4b   : > { %770 = vrot.lane.b32.xlu0 %v3205_v41, %s2981_s8  ;;  %v3263_v5 = vld [vmem:[#allocation2 + $0x62] sm:$0xff]  ;;  %v3271_v7 = vld [vmem:[#allocation2 + $0x7a] sm:$0xff]  ;;  %v3273_v8 = vld [vmem:[#allocation2 + $0x52] sm:$0xff] }
  0x4c   : > { %764 = vrot.lane.b32.xlu1 %v3207_v42, %s2981_s8  ;;  %v3279_v9 = vld [vmem:[#allocation2 + $0x92] sm:$0xff]  ;;  %v3281_v10 = vld [vmem:[#allocation2 + $0x6a] sm:$0xff]  ;;  %v3289_v12 = vld [vmem:[#allocation2 + $0x82] sm:$0xff] }
  0x4d   : > { %v3287_v11 = vld [vmem:[#allocation2 + $0xaa] sm:$0xff]  ;;  %v3295_v13 = vld [vmem:[#allocation2 + $0xc2] sm:$0xff]  ;;  %v3297_v14 = vld [vmem:[#allocation2 + $0x9a] sm:$0xff] }
  0x4e   : > { %v3303_v15 = vld [vmem:[#allocation2 + $0xda] sm:$0xff]  ;;  %v3305_v16 = vld [vmem:[#allocation2 + $0xb2] sm:$0xff]  ;;  %v3311_v18 = vld [vmem:[#allocation2 + $0xca] sm:$0xff] }
  0x4f   : > { %774 = vrot.lane.b32.xlu0 %v3213_v43, %s2981_s8  ;;  %v509_v17 = vld [vmem:[#allocation2 + $0xf2] sm:$0xff]  ;;  %v511_v19 = vld [vmem:[#allocation2 + $0x10a] sm:$0xff]  ;;  %v3316_v20 = vld [vmem:[#allocation2 + $0xe2] sm:$0xff] }
  0x50   : > { %768 = vrot.lane.b32.xlu1 %v3215_v44, %s2981_s8  ;;  %v513_v21 = vld [vmem:[#allocation2 + $0x122] sm:$0xff]  ;;  %v510_v22 = vld [vmem:[#allocation2 + $0xfa] sm:$0xff]  ;;  %v512_v26 = vld [vmem:[#allocation2 + $0x112] sm:$0xff] }
  0x51   : > { %v515_v23 = vld [vmem:[#allocation2 + $0x13a] sm:$0xff]  ;;  %v517_v27 = vld [vmem:[#allocation2 + $0x152] sm:$0xff]  ;;  %v514_v34 = vld [vmem:[#allocation2 + $0x12a] sm:$0xff] }
  0x52   : > { %v519_v35 = vld [vmem:[#allocation2 + $0x16a] sm:$0xff]  ;;  %v516_v38 = vld [vmem:[#allocation2 + $0x142] sm:$0xff] }
  0x53   : > { %778 = vrot.lane.b32.xlu0 %v473_v45, %s2981_s8 }
  0x54   : > { %772 = vrot.lane.b32.xlu1 %v3221_v46, %s2981_s8 }
  0x57   : > { %782 = vrot.lane.b32.xlu0 %v475_v47, %s2981_s8  ;;  %v518_v47 = vld [vmem:[#allocation2 + $0x15a] sm:$0xff] }
  0x58   : > { %776 = vrot.lane.b32.xlu1 %v3226_v48, %s2981_s8 }
  0x5b   : > { %786 = vrot.lane.b32.xlu0 %v477_v49, %s2981_s8  ;;  %v3339_v49 = vld [vmem:[#allocation2 + $0x18] sm:$0xff] }
  0x5c   : > { %780 = vrot.lane.b32.xlu1 %v474_v50, %s2981_s8 }
  0x5f   : > { %790 = vrot.lane.b32.xlu0 %v479_v51, %s2981_s8 }
  0x60   : > { %784 = vrot.lane.b32.xlu1 %v476_v52, %s2981_s8  ;;  %v520_v52 = vld [vmem:[#allocation2 + $0x172] sm:$0xff] }
  0x63   : > { %794 = vrot.lane.b32.xlu0 %v481_v53, %s2981_s8  ;;  %v3348_v53 = vld [vmem:[#allocation2 + $0x30] sm:$0xff] }
  0x64   : > { %788 = vrot.lane.b32.xlu1 %v478_v54, %s2981_s8 }
  0x67   : > { %798 = vrot.lane.b32.xlu0 %v483_v55, %s2981_s8 }
  0x68   : > { %792 = vrot.lane.b32.xlu1 %v480_v56, %s2981_s8  ;;  %v3357_v56 = vld [vmem:[#allocation2 + $0x48] sm:$0xff] }
  0x6b   : > { %802 = vrot.lane.b32.xlu0 %v485_v57, %s2981_s8 }
  0x6c   : > { %796 = vrot.lane.b32.xlu1 %v482_v58, %s2981_s8  ;;  %v3361_v58 = vld [vmem:[#allocation2 + $0x20] sm:$0xff] }
  0x6f   : > { %806 = vrot.lane.b32.xlu0 %v487_v59, %s2981_s8 }
  0x70   : > { %800 = vrot.lane.b32.xlu1 %v484_v60, %s2981_s8  ;;  %v3369_v60 = vld [vmem:[#allocation2 + $0x60] sm:$0xff] }
  0x73   : > { %874 = vrot.lane.b32.xlu0 %v489_v61, %s2982_s9 }
  0x74   : > { %804 = vrot.lane.b32.xlu1 %v486_v62, %s2981_s8  ;;  %v3373_v62 = vld [vmem:[#allocation2 + $0x38] sm:$0xff] }
  0x77   : > { %878 = vrot.lane.b32.xlu0 %v3245_v63, %s2982_s9 }
  0x78   : > { %808 = vrot.lane.b32.xlu1 %v488_v0, %s2981_s8 }
  0x7b   : > { %882 = vrot.lane.b32.xlu0 %v3250_v1, %s2982_s9 }
  0x7c   : > { %876 = vrot.lane.b32.xlu1 %v490_v2, %s2982_s9  ;;  %v3381_v2 = vld [vmem:[#allocation2 + $0x78] sm:$0xff] }
  0x7f   : > { %886 = vrot.lane.b32.xlu0 %v3255_v3, %s2982_s9 }
  0x80   : > { %880 = vrot.lane.b32.xlu1 %v3257_v4, %s2982_s9 }
  0x83   : > { %890 = vrot.lane.b32.xlu0 %v3263_v5, %s2982_s9 }
  0x84   : > { %884 = vrot.lane.b32.xlu1 %v3265_v6, %s2982_s9 }
  0x87   : > { %894 = vrot.lane.b32.xlu0 %v3271_v7, %s2982_s9 }
  0x88   : > { %888 = vrot.lane.b32.xlu1 %v3273_v8, %s2982_s9 }
  0x8b   : > { %898 = vrot.lane.b32.xlu0 %v3279_v9, %s2982_s9 }
  0x8c   : > { %892 = vrot.lane.b32.xlu1 %v3281_v10, %s2982_s9 }
  0x8f   : > { %902 = vrot.lane.b32.xlu0 %v3287_v11, %s2982_s9 }
  0x90   : > { %896 = vrot.lane.b32.xlu1 %v3289_v12, %s2982_s9 }
  0x93   : > { %906 = vrot.lane.b32.xlu0 %v3295_v13, %s2982_s9 }
  0x94   : > { %900 = vrot.lane.b32.xlu1 %v3297_v14, %s2982_s9 }
  0x97   : > { %910 = vrot.lane.b32.xlu0 %v3303_v15, %s2982_s9 }
  0x98   : > { %904 = vrot.lane.b32.xlu1 %v3305_v16, %s2982_s9 }
  0x9b   : > { %914 = vrot.lane.b32.xlu0 %v509_v17, %s2982_s9 }
  0x9c   : > { %908 = vrot.lane.b32.xlu1 %v3311_v18, %s2982_s9 }
  0x9f   : > { %918 = vrot.lane.b32.xlu0 %v511_v19, %s2982_s9  ;;  %v3385_v19 = vld [vmem:[#allocation2 + $0x50] sm:$0xff] }
  0xa0   : > { %912 = vrot.lane.b32.xlu1 %v3316_v20, %s2982_s9 }
  0xa2   : > { %v3323_v24 = vpop.permute.xlu0 %746 }
  0xa3   : > { %922 = vrot.lane.b32.xlu0 %v513_v21, %s2982_s9 }
  0xa4   : > { %916 = vrot.lane.b32.xlu1 %v510_v22, %s2982_s9  ;;  %v3393_v22 = vld [vmem:[#allocation2 + $0x90] sm:$0xff] }
  0xa5   : > { %4470 = vst [vmem:[#allocation12_spill] sm:$0xff] %v3393_v22 }
  0xa6   : > { %v3327_v33 = vpop.permute.xlu0 %748 }
  0xa7   : > { %926 = vrot.lane.b32.xlu0 %v515_v23, %s2982_s9 }
  0xa8   : > { %920 = vrot.lane.b32.xlu1 %v512_v26, %s2982_s9  ;;  %v3397_v26 = vld [vmem:[#allocation2 + $0x68] sm:$0xff] }
  0xab   : > { %930 = vrot.lane.b32.xlu0 %v517_v27, %s2982_s9 }
  0xac   : > { %924 = vrot.lane.b32.xlu1 %v514_v34, %s2982_s9  ;;  %v3405_v34 = vld [vmem:[#allocation2 + $0xa8] sm:$0xff] }
  0xad   : > { %v3331_v36 = vpop.permute.xlu0 %754  ;;  %4473 = vst [vmem:[#allocation15_spill] sm:$0xff] %v3405_v34 }
  0xae   : > { %v3333_v40 = vpop.permute.xlu1 %750 }
  0xaf   : > { %934 = vrot.lane.b32.xlu0 %v519_v35, %s2982_s9 }
  0xb0   : > { %928 = vrot.lane.b32.xlu1 %v516_v38, %s2982_s9  ;;  %v3409_v38 = vld [vmem:[#allocation2 + $0x80] sm:$0xff] }
  0xb1   : > { %v3337_v45 = vpop.permute.xlu0 %758 }
  0xb2   : > { %v3341_v50 = vpop.permute.xlu1 %752 }
  0xb3   : > { %1002 = vrot.lane.b32.xlu0 %v3339_v49, %s2983_s10 }
  0xb4   : > { %932 = vrot.lane.b32.xlu1 %v518_v47, %s2982_s9 }
  0xb5   : > { %v3346_v51 = vpop.permute.xlu0 %762 }
  0xb6   : > { %v3350_v54 = vpop.permute.xlu1 %756 }
  0xb7   : > { %1006 = vrot.lane.b32.xlu0 %v3348_v53, %s2983_s10 }
  0xb8   : > { %936 = vrot.lane.b32.xlu1 %v520_v52, %s2982_s9 }
  0xb9   : > { %v3355_v55 = vpop.permute.xlu0 %766 }
  0xba   : > { %v3359_v57 = vpop.permute.xlu1 %760 }
  0xbb   : > { %1010 = vrot.lane.b32.xlu0 %v3357_v56, %s2983_s10 }
  0xbc   : > { %1004 = vrot.lane.b32.xlu1 %v3361_v58, %s2983_s10 }
  0xbd   : > { %v3367_v59 = vpop.permute.xlu0 %770 }
  0xbe   : > { %4467 = vst [vmem:[#allocation9_spill] sm:$0xff] %v3367_v59  ;;  %v3371_v61 = vpop.permute.xlu1 %764 }
  0xbf   : > { %1014 = vrot.lane.b32.xlu0 %v3369_v60, %s2983_s10 }
  0xc0   : > { %1008 = vrot.lane.b32.xlu1 %v3373_v62, %s2983_s10 }
  0xc1   : > { %v3379_v0 = vpop.permute.xlu0 %774 }
  0xc2   : > { %4468 = vst [vmem:[#allocation10_spill] sm:$0xff] %v3379_v0  ;;  %v3383_v17 = vpop.permute.xlu1 %768 }
  0xc3   : > { %1018 = vrot.lane.b32.xlu0 %v3381_v2, %s2983_s10 }
  0xc4   : > { %1012 = vrot.lane.b32.xlu1 %v3385_v19, %s2983_s10 }
  0xc5   : > { %v3391_v21 = vpop.permute.xlu0 %778 }
  0xc6   : > { %4469 = vst [vmem:[#allocation11_spill] sm:$0xff] %v3391_v21  ;;  %v3395_v23 = vpop.permute.xlu1 %772  ;;  %v3419_v21 = vld [vmem:[#allocation2 + $0x98] sm:$0xff] }
  0xc7   : > { %4471 = vst [vmem:[#allocation13_spill] sm:$0xff] %v3395_v23  ;;  %1022 = vrot.lane.b32.xlu0 %v3393_v22, %s2983_s10  ;;  %4477 = vst [vmem:[#allocation19_spill] sm:$0xff] %v3419_v21 }
  0xc8   : > { %1016 = vrot.lane.b32.xlu1 %v3397_v26, %s2983_s10 }
  0xc9   : > { %v3403_v27 = vpop.permute.xlu0 %782 }
  0xca   : > { %4472 = vst [vmem:[#allocation14_spill] sm:$0xff] %v3403_v27  ;;  %v3407_v35 = vpop.permute.xlu1 %776 }
  0xcb   : > { %4474 = vst [vmem:[#allocation16_spill] sm:$0xff] %v3407_v35  ;;  %1026 = vrot.lane.b32.xlu0 %v3405_v34, %s2983_s10 }
  0xcc   : > { %1020 = vrot.lane.b32.xlu1 %v3409_v38, %s2983_s10 }
  0xcd   : > { %v3415_v47 = vpop.permute.xlu0 %786 }
  0xce   : > { %4475 = vst [vmem:[#allocation17_spill] sm:$0xff] %v3415_v47  ;;  %v3417_v52 = vpop.permute.xlu1 %780  ;;  %v2001_v47 = vld [vmem:[%s4458_s3] sm:$0xff] }
  0xcf   : > { %4476 = vst [vmem:[#allocation18_spill] sm:$0xff] %v3417_v52  ;;  %1132 = vrot.lane.b32.xlu0 %v3171_v30, %s2984_s11  ;;  %v2002_v52 = vld [vmem:[%s4458_s3 + $0x8] sm:$0xff] }
  0xd0   : > { %1024 = vrot.lane.b32.xlu1 %v3419_v21, %s2983_s10  ;;  %v2835_v30 = vpack.c.bf16 %v2002_v52, %v2001_v47 }
  0xd1   : > { %v3425_v27 = vpop.permute.xlu0 %790 }
  0xd2   : > { %4478 = vst [vmem:[#allocation20_spill] sm:$0xff] %v3425_v27  ;;  %v3427_v0 = vpop.permute.xlu1 %784  ;;  %2836 = vmatprep.subr.bf16.mxu0 %v2835_v30  ;;  %2843 = vmatprep.subr.bf16.mxu1 %v2835_v30 }
  0xd3   : > { %4479 = vst [vmem:[#allocation21_spill] sm:$0xff] %v3427_v0  ;;  %1260 = vrot.lane.b32.xlu0 %v3257_v4, %s2985_s12  ;;  %2838 = vmatpush3.bf16.msra.mxu0 %v2835_v30  ;;  %v2003_v4 = vld [vmem:[%s4458_s3 + $0x10] sm:$0xff] }
  0xd4   : > { %1130 = vrot.lane.b32.xlu1 %v3163_v28, %s2984_s11  ;;  %v2004_v28 = vld [vmem:[%s4458_s3 + $0x18] sm:$0xff]  ;;  %2846 = vmatpush3.bf16.msra.mxu1 %v2835_v30 }
  0xd5   : > { %v3439_v35 = vpop.permute.xlu0 %794  ;;  %v2839_v47 = vpack.c.bf16 %v2004_v28, %v2003_v4 }
  0xd6   : > { %4480 = vst [vmem:[#allocation22_spill] sm:$0xff] %v3439_v35  ;;  %v3441_v27 = vpop.permute.xlu1 %788 }
  0xd7   : > { %4481 = vst [vmem:[#allocation23_spill] sm:$0xff] %v3441_v27  ;;  %1388 = vrot.lane.b32.xlu0 %v3373_v62, %s2986_s17  ;;  %2840 = vmatprep.subr.bf16.mxu0 %v2839_v47  ;;  %v2005_v27 = vld [vmem:[%s4458_s3 + $0x20] sm:$0xf] }
  0xd8   : > { %1258 = vrot.lane.b32.xlu1 %v3245_v63, %s2985_s12  ;;  %2844 = vmatprep.subr.bf16.mxu1 %v2839_v47 }
  0xd9   : > { %v3453_v52 = vpop.permute.xlu0 %798  ;;  %2842 = vmatpush3.bf16.msra.mxu0 %v2839_v47  ;;  %2847 = vmatpush3.bf16.msra.mxu1 %v2839_v47 }
  0xda   : > { %4482 = vst [vmem:[#allocation24_spill] sm:$0xff] %v3453_v52  ;;  %v3455_v35 = vpop.permute.xlu1 %792  ;;  %2785 = vmatprep.subr.msk.mxu0 %vm2103_vm4, %v2005_v27  ;;  %2845 = vmatprep.subr.msk.mxu1 %vm2103_vm4, %v2005_v27 }
  0xdb   : > { %4483 = vst [vmem:[#allocation25_spill] sm:$0xff] %v3455_v35  ;;  %1134 = vrot.lane.b32.xlu0 %v3154_v25, %s2984_s11 }
  0xdc   : > { %1386 = vrot.lane.b32.xlu1 %v3348_v53, %s2986_s17 }
  0xdd   : > { %v3464_v63 = vpop.permute.xlu0 %802  ;;  %2786 = vmatpush3.msk.msra.mxu0 %vm2103_vm4, %v2005_v27  ;;  %2848 = vmatpush3.msk.msra.mxu1 %vm2103_vm4, %v2005_v27 }
  0xde   : > { %4484 = vst [vmem:[#allocation26_spill] sm:$0xff] %v3464_v63  ;;  %v3466_v30 = vpop.permute.xlu1 %796 }
  0xdf   : > { %4485 = vst [vmem:[#allocation27_spill] sm:$0xff] %v3466_v30  ;;  %1642 = vrot.lane.b32.xlu0 %v3250_v1, %s2987_s26 }
  0xe0   : > { %1514 = vrot.lane.b32.xlu1 %v3154_v25, %s2988_s27 }
  0xe1   : > { %v3472_v4 = vpop.permute.xlu0 %806 }
  0xe2   : > { %4486 = vst [vmem:[#allocation28_spill] sm:$0xff] %v3472_v4  ;;  %v3474_v28 = vpop.permute.xlu1 %800 }
  0xe3   : > { %4487 = vst [vmem:[#allocation29_spill] sm:$0xff] %v3474_v28  ;;  %1262 = vrot.lane.b32.xlu0 %v3250_v1, %s2985_s12 }
  0xe4   : > { %1516 = vrot.lane.b32.xlu1 %v3179_v32, %s2988_s27 }
  0xe5   : > { %v3480_v47 = vpop.permute.xlu0 %874 }
  0xe6   : > { %v3482_v63 = vpop.permute.xlu1 %804 }
  0xe7   : > { %4488 = vst [vmem:[#allocation30_spill] sm:$0xff] %v3482_v63  ;;  %1264 = vrot.lane.b32.xlu0 %v3265_v6, %s2985_s12 }
  0xe8   : > { %1136 = vrot.lane.b32.xlu1 %v3179_v32, %s2984_s11 }
  0xe9   : > { %v3488_v25 = vpop.permute.xlu0 %878 }
  0xea   : > { %v3490_v27 = vpop.permute.xlu1 %808 }
  0xeb   : > { %4489 = vst [vmem:[#allocation31_spill] sm:$0xff] %v3490_v27  ;;  %1392 = vrot.lane.b32.xlu0 %v3385_v19, %s2986_s17 }
  0xec   : > { %1644 = vrot.lane.b32.xlu1 %v3265_v6, %s2987_s26 }
  0xed   : > { %v3496_v1 = vpop.permute.xlu0 %882 }
  0xee   : > { %v3498_v4 = vpop.permute.xlu1 %876 }
  0xef   : > { %1138 = vrot.lane.b32.xlu0 %v3169_v29, %s2984_s11 }
  0xf0   : > { %1390 = vrot.lane.b32.xlu1 %v3357_v56, %s2986_s17 }
  0xf1   : > { %v3504_v32 = vpop.permute.xlu0 %886 }
  0xf2   : > { %v3506_v63 = vpop.permute.xlu1 %880 }
  0xf3   : > { %1646 = vrot.lane.b32.xlu0 %v3255_v3, %s2987_s26 }
  0xf4   : > { %1518 = vrot.lane.b32.xlu1 %v3169_v29, %s2988_s27 }
  0xf5   : > { %v3512_v6 = vpop.permute.xlu0 %890 }
  0xf6   : > { %v3514_v27 = vpop.permute.xlu1 %884 }
  0xf7   : > { %1266 = vrot.lane.b32.xlu0 %v3255_v3, %s2985_s12 }
  0xf8   : > { %1520 = vrot.lane.b32.xlu1 %v3196_v39, %s2988_s27 }
  0xf9   : > { %v3520_v52 = vpop.permute.xlu0 %894 }
  0xfa   : > { %v3522_v28 = vpop.permute.xlu1 %888 }
  0xfb   : > { %1268 = vrot.lane.b32.xlu0 %v3273_v8, %s2985_s12 }
  0xfc   : > { %1140 = vrot.lane.b32.xlu1 %v3196_v39, %s2984_s11 }
  0xfd   : > { %v3528_v29 = vpop.permute.xlu0 %898 }
  0xfe   : > { %4490 = vst [vmem:[#allocation32_spill] sm:$0xff] %v3528_v29  ;;  %v3530_v30 = vpop.permute.xlu1 %892 }
  0xff   : > { %1396 = vrot.lane.b32.xlu0 %v3397_v26, %s2986_s17 }
 0x100   : > { %1648 = vrot.lane.b32.xlu1 %v3273_v8, %s2987_s26 }
 0x101   : > { %v3536_v3 = vpop.permute.xlu0 %902 }
 0x102   : > { %4491 = vst [vmem:[#allocation33_spill] sm:$0xff] %v3536_v3  ;;  %v3538_v35 = vpop.permute.xlu1 %896 }
 0x103   : > { %1142 = vrot.lane.b32.xlu0 %v3177_v31, %s2984_s11 }
 0x104   : > { %1394 = vrot.lane.b32.xlu1 %v3369_v60, %s2986_s17 }
 0x105   : > { %v3544_v39 = vpop.permute.xlu0 %906 }
 0x106   : > { %4492 = vst [vmem:[#allocation34_spill] sm:$0xff] %v3544_v39  ;;  %v3546_v0 = vpop.permute.xlu1 %900 }
 0x107   : > { %4493 = vst [vmem:[#allocation35_spill] sm:$0xff] %v3546_v0  ;;  %1650 = vrot.lane.b32.xlu0 %v3263_v5, %s2987_s26 }
 0x108   : > { %1522 = vrot.lane.b32.xlu1 %v3177_v31, %s2988_s27 }
 0x109   : > { %v3552_v8 = vpop.permute.xlu0 %910 }
 0x10a   : > { %4494 = vst [vmem:[#allocation36_spill] sm:$0xff] %v3552_v8  ;;  %v3554_v3 = vpop.permute.xlu1 %904 }
 0x10b   : > { %4495 = vst [vmem:[#allocation37_spill] sm:$0xff] %v3554_v3  ;;  %1270 = vrot.lane.b32.xlu0 %v3263_v5, %s2985_s12 }
 0x10c   : > { %1524 = vrot.lane.b32.xlu1 %v3207_v42, %s2988_s27 }
 0x10d   : > { %v3560_v29 = vpop.permute.xlu0 %914 }
 0x10e   : > { %4496 = vst [vmem:[#allocation38_spill] sm:$0xff] %v3560_v29  ;;  %v3562_v39 = vpop.permute.xlu1 %908 }
 0x10f   : > { %4497 = vst [vmem:[#allocation39_spill] sm:$0xff] %v3562_v39  ;;  %1272 = vrot.lane.b32.xlu0 %v3281_v10, %s2985_s12 }
 0x110   : > { %1144 = vrot.lane.b32.xlu1 %v3207_v42, %s2984_s11 }
 0x111   : > { %v3568_v31 = vpop.permute.xlu0 %918 }
 0x112   : > { %4498 = vst [vmem:[#allocation40_spill] sm:$0xff] %v3568_v31  ;;  %v3570_v8 = vpop.permute.xlu1 %912 }
 0x113   : > { %4499 = vst [vmem:[#allocation41_spill] sm:$0xff] %v3570_v8  ;;  %1400 = vrot.lane.b32.xlu0 %v3409_v38, %s2986_s17 }
 0x114   : > { %1652 = vrot.lane.b32.xlu1 %v3281_v10, %s2987_s26 }
 0x115   : > { %v3576_v5 = vpop.permute.xlu0 %922 }
 0x116   : > { %4500 = vst [vmem:[#allocation42_spill] sm:$0xff] %v3576_v5  ;;  %v3578_v29 = vpop.permute.xlu1 %916 }
 0x117   : > { %4501 = vst [vmem:[#allocation43_spill] sm:$0xff] %v3578_v29  ;;  %1146 = vrot.lane.b32.xlu0 %v3190_v37, %s2984_s11 }
 0x118   : > { %1398 = vrot.lane.b32.xlu1 %v3381_v2, %s2986_s17 }
 0x119   : > { %v3584_v42 = vpop.permute.xlu0 %926 }
 0x11a   : > { %4502 = vst [vmem:[#allocation44_spill] sm:$0xff] %v3584_v42  ;;  %v3586_v31 = vpop.permute.xlu1 %920 }
 0x11b   : > { %4503 = vst [vmem:[#allocation45_spill] sm:$0xff] %v3586_v31  ;;  %1654 = vrot.lane.b32.xlu0 %v3271_v7, %s2987_s26  ;;  %v3648_v31 = vld [vmem:[#allocation2 + $0xb0] sm:$0xff] }
 0x11c   : > { %1526 = vrot.lane.b32.xlu1 %v3190_v37, %s2988_s27  ;;  %4511 = vst [vmem:[#allocation53_spill] sm:$0xff] %v3648_v31 }
 0x11d   : > { %v3592_v10 = vpop.permute.xlu0 %930 }
 0x11e   : > { %4504 = vst [vmem:[#allocation46_spill] sm:$0xff] %v3592_v10  ;;  %v3594_v5 = vpop.permute.xlu1 %924 }
 0x11f   : > { %4505 = vst [vmem:[#allocation47_spill] sm:$0xff] %v3594_v5  ;;  %1274 = vrot.lane.b32.xlu0 %v3271_v7, %s2985_s12 }
 0x120   : > { %1528 = vrot.lane.b32.xlu1 %v3215_v44, %s2988_s27 }
 0x121   : > { %v3600_v29 = vpop.permute.xlu0 %934 }
 0x122   : > { %4506 = vst [vmem:[#allocation48_spill] sm:$0xff] %v3600_v29  ;;  %v3602_v42 = vpop.permute.xlu1 %928 }
 0x123   : > { %4507 = vst [vmem:[#allocation49_spill] sm:$0xff] %v3602_v42  ;;  %1276 = vrot.lane.b32.xlu0 %v3289_v12, %s2985_s12 }
 0x124   : > { %1148 = vrot.lane.b32.xlu1 %v3215_v44, %s2984_s11 }
 0x125   : > { %v1003_v37 = vpop.permute.xlu0 %1002 }
 0x126   : > { %v3608_v10 = vpop.permute.xlu1 %932 }
 0x127   : > { %4508 = vst [vmem:[#allocation50_spill] sm:$0xff] %v3608_v10  ;;  %1404 = vrot.lane.b32.xlu0 %v3419_v21, %s2986_s17  ;;  %v3680_v21 = vld [vmem:[#allocation2 + $0xc0] sm:$0xff] }
 0x128   : > { %1656 = vrot.lane.b32.xlu1 %v3289_v12, %s2987_s26  ;;  %4513 = vst [vmem:[#allocation55_spill] sm:$0xff] %v3680_v21 }
 0x129   : > { %v3614_v7 = vpop.permute.xlu0 %1006 }
 0x12a   : > { %v3616_v29 = vpop.permute.xlu1 %936 }
 0x12b   : > { %4509 = vst [vmem:[#allocation51_spill] sm:$0xff] %v3616_v29  ;;  %1150 = vrot.lane.b32.xlu0 %v3205_v41, %s2984_s11 }
 0x12c   : > { %1402 = vrot.lane.b32.xlu1 %v3393_v22, %s2986_s17 }
 0x12d   : > { %v3622_v44 = vpop.permute.xlu0 %1010 }
 0x12e   : > { %v3624_v42 = vpop.permute.xlu1 %1004 }
 0x12f   : > { %1658 = vrot.lane.b32.xlu0 %v3279_v9, %s2987_s26 }
 0x130   : > { %1530 = vrot.lane.b32.xlu1 %v3205_v41, %s2988_s27 }
 0x131   : > { %v3630_v12 = vpop.permute.xlu0 %1014 }
 0x132   : > { %v3632_v10 = vpop.permute.xlu1 %1008 }
 0x133   : > { %1278 = vrot.lane.b32.xlu0 %v3279_v9, %s2985_s12 }
 0x134   : > { %1532 = vrot.lane.b32.xlu1 %v3221_v46, %s2988_s27 }
 0x135   : > { %v3638_v29 = vpop.permute.xlu0 %1018 }
 0x136   : > { %v3640_v5 = vpop.permute.xlu1 %1012 }
 0x137   : > { %1280 = vrot.lane.b32.xlu0 %v3297_v14, %s2985_s12 }
 0x138   : > { %1152 = vrot.lane.b32.xlu1 %v3221_v46, %s2984_s11 }
 0x139   : > { %v3646_v41 = vpop.permute.xlu0 %1022 }
 0x13a   : > { %4510 = vst [vmem:[#allocation52_spill] sm:$0xff] %v3646_v41  ;;  %v3650_v8 = vpop.permute.xlu1 %1016 }
 0x13b   : > { %1408 = vrot.lane.b32.xlu0 %v3648_v31, %s2986_s17 }
 0x13c   : > { %1660 = vrot.lane.b32.xlu1 %v3297_v14, %s2987_s26 }
 0x13d   : > { %v3656_v9 = vpop.permute.xlu0 %1026 }
 0x13e   : > { %4512 = vst [vmem:[#allocation54_spill] sm:$0xff] %v3656_v9  ;;  %v3658_v39 = vpop.permute.xlu1 %1020  ;;  %v425_v9 = vld [vmem:[#allocation2] sm:$0xff] }
 0x13f   : > { %1028 = vrot.lane.b32.xlu0 %v3648_v31, %s2983_s10  ;;  %v1738_v22 = vsel %vm392_vm3, %v425_v9, %v3323_v24 }
 0x140   : > { %1406 = vrot.lane.b32.xlu1 %v3405_v34, %s2986_s17 }
 0x141   : > { %v1133_v46 = vpop.permute.xlu0 %1132 }
 0x142   : > { %v3664_v3 = vpop.permute.xlu1 %1024 }
 0x143   : > { %1536 = vrot.lane.b32.xlu0 %v3226_v48, %s2988_s27 }
 0x144   : > { %1534 = vrot.lane.b32.xlu1 %v3213_v43, %s2988_s27 }
 0x145   : > { %v1261_v14 = vpop.permute.xlu0 %1260 }
 0x146   : > { %v1131_v0 = vpop.permute.xlu1 %1130 }
 0x147   : > { %1156 = vrot.lane.b32.xlu0 %v3226_v48, %s2984_s11 }
 0x148   : > { %1154 = vrot.lane.b32.xlu1 %v3213_v43, %s2984_s11  ;;  %v1771_v43 = vsel %vm1770_vm5, %v1738_v22, %v3480_v47  ;;  %v3691_v22 = vld [vmem:[#allocation2 + $0xc8] sm:$0xff] }
 0x149   : > { %v1389_v31 = vpop.permute.xlu0 %1388  ;;  %v1804_v23 = vsel %vm1803_vm6, %v1771_v43, %v1003_v37 }
 0x14a   : > { %v1259_v34 = vpop.permute.xlu1 %1258  ;;  %v1837_v41 = vsel %vm1836_vm7, %v1804_v23, %v1131_v0  ;;  %v426_v0 = vld [vmem:[#allocation2 + $0x8] sm:$0xff] }
 0x14b   : > { %1664 = vrot.lane.b32.xlu0 %v3305_v16, %s2987_s26  ;;  %v1870_v24 = vsel %vm1869_vm8, %v1837_v41, %v1259_v34  ;;  %v1739_v41 = vsel %vm392_vm3, %v426_v0, %v3327_v33 }
 0x14c   : > { %1662 = vrot.lane.b32.xlu1 %v3287_v11, %s2987_s26 }
 0x14d   : > { %v1135_v59 = vpop.permute.xlu0 %1134 }
 0x14e   : > { %v1387_v48 = vpop.permute.xlu1 %1386 }
 0x14f   : > { %1410 = vrot.lane.b32.xlu0 %v3680_v21, %s2986_s17  ;;  %v1903_v47 = vsel %vm1902_vm10, %v1870_v24, %v1387_v48  ;;  %v663_v48 = vld [vmem:[#allocation2 + $0xc9] sm:$0xff] }
 0x150   : > { %1282 = vrot.lane.b32.xlu1 %v3287_v11, %s2985_s12 }
 0x151   : > { %v1643_v9 = vpop.permute.xlu0 %1642 }
 0x152   : > { %v1515_v37 = vpop.permute.xlu1 %1514 }
 0x153   : > { %v1936_v43 = vsel %vm1935_vm9, %v1903_v47, %v1515_v37  ;;  %1412 = vrot.lane.b32.xlu0 %v3691_v22, %s2986_s17 }
 0x154   : > { %1284 = vrot.lane.b32.xlu1 %v3305_v16, %s2985_s12  ;;  %v1969_v11 = vsel %vm1968_vm11, %v1936_v43, %v1643_v9  ;;  %v1772_v16 = vsel %vm1770_vm5, %v1739_v41, %v3498_v4  ;;  %v662_v9 = vld [vmem:[#allocation2 + $0xc1] sm:$0xff] }
 0x155   : > { %2787 = vmatprep.mubr.msk.f32.mxu0 %vm2006_vm12, %v1969_v11  ;;  %v1263_v23 = vpop.permute.xlu0 %1262  ;;  %v1805_v47 = vsel %vm1803_vm6, %v1772_v16, %v3624_v42  ;;  %v1740_v42 = vsel %vm392_vm3, %v3339_v49, %v3333_v40  ;;  %v3734_v40 = vld [vmem:[#allocation2 + $0xd8] sm:$0xff] }
 0x156   : > { %v1517_v34 = vpop.permute.xlu1 %1516  ;;  %v1838_v43 = vsel %vm1836_vm7, %v1805_v47, %v1133_v46  ;;  %v3747_v47 = vld [vmem:[#allocation2 + $0xe0] sm:$0xff] }
 0x157   : > { %1032 = vrot.lane.b32.xlu0 %v3691_v22, %s2983_s10  ;;  %v1871_v11 = vsel %vm1869_vm8, %v1838_v43, %v1261_v14 }
 0x158   : > { %1030 = vrot.lane.b32.xlu1 %v3680_v21, %s2983_s10  ;;  %v1904_v33 = vsel %vm1902_vm10, %v1871_v11, %v1389_v31  ;;  %v1773_v31 = vsel %vm1770_vm5, %v1740_v42, %v3488_v25 }
 0x159   : > { %v1265_v24 = vpop.permute.xlu0 %1264  ;;  %v1937_v21 = vsel %vm1935_vm9, %v1904_v33, %v1517_v34  ;;  %v1806_v34 = vsel %vm1803_vm6, %v1773_v31, %v3614_v7 }
 0x15a   : > { %v1137_v37 = vpop.permute.xlu1 %1136 }
 0x15b   : > { %1540 = vrot.lane.b32.xlu0 %v663_v48, %s2988_s27 }
 0x15c   : > { %1538 = vrot.lane.b32.xlu1 %v662_v9, %s2988_s27 }
 0x15d   : > { %v1393_v0 = vpop.permute.xlu0 %1392 }
 0x15e   : > { %v1645_v4 = vpop.permute.xlu1 %1644 }
 0x15f   : > { %v1970_v41 = vsel %vm1968_vm11, %v1937_v21, %v1645_v4  ;;  %1160 = vrot.lane.b32.xlu0 %v663_v48, %s2984_s11  ;;  %v1839_v21 = vsel %vm1836_vm7, %v1806_v34, %v1135_v59 }
 0x160   : > { %1158 = vrot.lane.b32.xlu1 %v662_v9, %s2984_s11  ;;  %2788 = vmatmul.mubr.msk.f32.vlgmr.msra.gmra.mrb[0].mxu0 %vm2006_vm12, %v1970_v41  ;;  %v1872_v48 = vsel %vm1869_vm8, %v1839_v21, %v1263_v23  ;;  %v1741_v23 = vsel %vm392_vm3, %v3361_v58, %v3341_v50  ;;  %v665_v58 = vld [vmem:[#allocation2 + $0xe1] sm:$0xff] }
 0x161   : > { %v1139_v46 = vpop.permute.xlu0 %1138  ;;  %v1774_v11 = vsel %vm1770_vm5, %v1741_v23, %v3506_v63 }
 0x162   : > { %v1391_v14 = vpop.permute.xlu1 %1390 }
 0x163   : > { %1668 = vrot.lane.b32.xlu0 %v3311_v18, %s2987_s26  ;;  %v1905_v49 = vsel %vm1902_vm10, %v1872_v48, %v1391_v14 }
 0x164   : > { %1666 = vrot.lane.b32.xlu1 %v3295_v13, %s2987_s26 }
 0x165   : > { %v1647_v16 = vpop.permute.xlu0 %1646 }
 0x166   : > { %v1519_v25 = vpop.permute.xlu1 %1518 }
 0x167   : > { %v1938_v9 = vsel %vm1935_vm9, %v1905_v49, %v1519_v25  ;;  %1414 = vrot.lane.b32.xlu0 %v3734_v40, %s2986_s17 }
 0x168   : > { %1286 = vrot.lane.b32.xlu1 %v3295_v13, %s2985_s12  ;;  %v1971_v59 = vsel %vm1968_vm11, %v1938_v9, %v1647_v16  ;;  %v1807_v13 = vsel %vm1803_vm6, %v1774_v11, %v3632_v10  ;;  %v664_v10 = vld [vmem:[#allocation2 + $0xd9] sm:$0xff]  ;;  %v1743_v9 = vsel %vm392_vm3, %v3373_v62, %v3350_v54 }
 0x169   : > { %2790 = vmatprep.mubr.msk.f32.mxu0 %vm2006_vm12, %v1971_v59  ;;  %v1267_v7 = vpop.permute.xlu0 %1266  ;;  %v1840_v33 = vsel %vm1836_vm7, %v1807_v13, %v1137_v37  ;;  %v3791_v59 = vld [vmem:[#allocation2 + $0xf0] sm:$0xff]  ;;  %v1776_v23 = vsel %vm1770_vm5, %v1743_v9, %v3514_v27  ;;  %v3801_v13 = vld [vmem:[#allocation2 + $0xf8] sm:$0xff] }
 0x16a   : > { %v1521_v43 = vpop.permute.xlu1 %1520  ;;  %v1873_v50 = vsel %vm1869_vm8, %v1840_v33, %v1265_v24  ;;  %v1742_v24 = vsel %vm392_vm3, %v3348_v53, %v3331_v36  ;;  %v3854_v9 = vld [vmem:[#allocation2 + $0x110] sm:$0xff] }
 0x16b   : > { %1416 = vrot.lane.b32.xlu0 %v3747_v47, %s2986_s17  ;;  %v1906_v63 = vsel %vm1902_vm10, %v1873_v50, %v1393_v0  ;;  %v1775_v0 = vsel %vm1770_vm5, %v1742_v24, %v3496_v1 }
 0x16c   : > { %1288 = vrot.lane.b32.xlu1 %v3311_v18, %s2985_s12  ;;  %v1939_v31 = vsel %vm1935_vm9, %v1906_v63, %v1521_v43  ;;  %v1808_v21 = vsel %vm1803_vm6, %v1775_v0, %v3622_v44 }
 0x16d   : > { %v1269_v4 = vpop.permute.xlu0 %1268  ;;  %v1841_v48 = vsel %vm1836_vm7, %v1808_v21, %v1139_v46  ;;  %v601_v46 = vld [vmem:[#allocation2 + $0xda] sm:$0xff] }
 0x16e   : > { %v1141_v41 = vpop.permute.xlu1 %1140  ;;  %v1874_v16 = vsel %vm1869_vm8, %v1841_v48, %v1267_v7  ;;  %v699_v21 = vld [vmem:[#allocation2 + $0xfa] sm:$0xff]  ;;  %v698_v48 = vld [vmem:[#allocation2 + $0xf2] sm:$0xff] }
 0x16f   : > { %1036 = vrot.lane.b32.xlu0 %v3747_v47, %s2983_s10 }
 0x170   : > { %1034 = vrot.lane.b32.xlu1 %v3734_v40, %s2983_s10 }
 0x171   : > { %v1397_v42 = vpop.permute.xlu0 %1396 }
 0x172   : > { %v1649_v18 = vpop.permute.xlu1 %1648 }
 0x173   : > { %v1972_v37 = vsel %vm1968_vm11, %v1939_v31, %v1649_v18  ;;  %1544 = vrot.lane.b32.xlu0 %v665_v58, %s2988_s27 }
 0x174   : > { %1542 = vrot.lane.b32.xlu1 %v664_v10, %s2988_s27  ;;  %2791 = vmatmul.mubr.msk.f32.gmra.mrb[2].mxu0 %vm2006_vm12, %v1972_v37  ;;  %v390_v37 = vld [vmem:[%s3048_s28 + $0xf8] sm:$0xff] }
 0x175   : > { %v1143_v14 = vpop.permute.xlu0 %1142  ;;  %424 = vst.msk [vmem:[#allocation2 + $0x189] sm:$0xff] %vm392_vm3, %v390_v37  ;;  %v700_v37 = vld [vmem:[#allocation2 + $0x10a] sm:$0xff] }
 0x176   : > { %v1395_v34 = vpop.permute.xlu1 %1394 }
 0x177   : > { %1164 = vrot.lane.b32.xlu0 %v665_v58, %s2984_s11  ;;  %v1907_v25 = vsel %vm1902_vm10, %v1874_v16, %v1395_v34  ;;  %v389_v58 = vld [vmem:[%s3048_s28 + $0xf0] sm:$0xff]  ;;  %v1745_v16 = vsel %vm392_vm3, %v3385_v19, %v3359_v57  ;;  %s2989_s28 = smov [#allocation3]  }
 0x178   : > { %1162 = vrot.lane.b32.xlu1 %v664_v10, %s2984_s11  ;;  %423 = vst.msk [vmem:[#allocation2 + $0x181] sm:$0xff] %vm392_vm3, %v389_v58  ;;  %s2561_s29 = sshll.u32 %s2989_s28, 4  ;;  %s2562_s29 = int_to_ptr.vmem [resolvable:$true] %s2561_s29 }
 0x179   : > { %v1651_v49 = vpop.permute.xlu0 %1650  ;;  %s2896_s9 = scalar_lea.vmem %s2562_s29, 16  ;;  %s2902_s22 = scalar_lea.vmem %s2562_s29, 32 }
 0x17a   : > { %v1523_v36 = vpop.permute.xlu1 %1522  ;;  %p2897_p7 = scmp.ne.s32.totalorder %s2562_s29, %s2896_s9  ;;  %p2903_p10 = scmp.lt.s32.totalorder %s2562_s29, %s2562_s29 }
 0x17b   : > { %v1940_v53 = vsel %vm1935_vm9, %v1907_v25, %v1523_v36  ;;  %1672 = vrot.lane.b32.xlu0 %v3316_v20, %s2987_s26  ;;  %v1778_v25 = vsel %vm1770_vm5, %v1745_v16, %v3522_v28  ;;  %p2904_p11 = scmp.lt.s32.totalorder %s2902_s22, %s2896_s9 }
 0x17c   : > { %1670 = vrot.lane.b32.xlu1 %v3303_v15, %s2987_s26  ;;  %v1973_v1 = vsel %vm1968_vm11, %v1940_v53, %v1651_v49  ;;  %v1809_v15 = vsel %vm1803_vm6, %v1776_v23, %v3640_v5  ;;  %v1811_v36 = vsel %vm1803_vm6, %v1778_v25, %v3650_v8  ;;  %v1748_v25 = vsel %vm392_vm3, %v3381_v2, %v3355_v55  ;;  %p2898_p8 = pnand %p2897_p7, %p4388_p6 }
 0x17d   : > { %2793 = vmatprep.mubr.msk.f32.mxu0 %vm2006_vm12, %v1973_v1  ;;  %v1271_v44 = vpop.permute.xlu0 %1270  ;;  %v1842_v43 = vsel %vm1836_vm7, %v1809_v15, %v1141_v41  ;;  %v1746_v15 = vsel %vm392_vm3, %v3369_v60, %v3346_v51  ;;  %p2905_p12 = por %p2904_p11, %p2903_p10 }
 0x17e   : > { %v1525_v7 = vpop.permute.xlu1 %1524  ;;  %v1875_v62 = vsel %vm1869_vm8, %v1842_v43, %v1269_v4  ;;  %v667_v4 = vld [vmem:[#allocation2 + $0xf9] sm:$0xff]  ;;  %p2899_p9 = pneg %p2898_p8 }
 0x17f   : > { %1418 = vrot.lane.b32.xlu0 %v3791_v59, %s2986_s17  ;;  %v1908_v27 = vsel %vm1902_vm10, %v1875_v62, %v1397_v42  ;;  %v666_v42 = vld [vmem:[#allocation2 + $0xf1] sm:$0xff] }
 0x180   : > { %1290 = vrot.lane.b32.xlu1 %v601_v46, %s2985_s12  ;;  %v1941_v5 = vsel %vm1935_vm9, %v1908_v27, %v1525_v7  ;;  %p2906_p13 = pnand %p2905_p12, %p2899_p9 }
 0x181   : > { %v1273_v11 = vpop.permute.xlu0 %1272 }
 0x182   : > { %v1145_v54 = vpop.permute.xlu1 %1144 }
 0x183   : > { %1420 = vrot.lane.b32.xlu0 %v3801_v13, %s2986_s17  ;;  %v1844_v53 = vsel %vm1836_vm7, %v1811_v36, %v1145_v54 }
 0x184   : > { %1292 = vrot.lane.b32.xlu1 %v3316_v20, %s2985_s12  ;;  %v1744_v20 = vsel %vm392_vm3, %v3357_v56, %v3337_v45  ;;  %v1877_v57 = vsel %vm1869_vm8, %v1844_v53, %v1273_v11  ;;  %v1779_v11 = vsel %vm1770_vm5, %v1746_v15, %v3512_v6  ;;  %v670_v53 = vld [vmem:[#allocation2 + $0x121] sm:$0xff] }
 0x185   : > { %v1401_v33 = vpop.permute.xlu0 %1400  ;;  %v1777_v10 = vsel %vm1770_vm5, %v1744_v20, %v3504_v32  ;;  %v1812_v62 = vsel %vm1803_vm6, %v1779_v11, %v3638_v29  ;;  %v703_v11 = vld [vmem:[#allocation2 + $0x12a] sm:$0xff] }
 0x186   : > { %v1653_v50 = vpop.permute.xlu1 %1652  ;;  %v1810_v18 = vsel %vm1803_vm6, %v1777_v10, %v3630_v12  ;;  %v1910_v19 = vsel %vm1902_vm10, %v1877_v57, %v1401_v33  ;;  %v669_v33 = vld [vmem:[#allocation2 + $0x111] sm:$0xff] }
 0x187   : > { %v1974_v41 = vsel %vm1968_vm11, %v1941_v5, %v1653_v50  ;;  %1040 = vrot.lane.b32.xlu0 %v3801_v13, %s2983_s10  ;;  %v1843_v24 = vsel %vm1836_vm7, %v1810_v18, %v1143_v14  ;;  %v668_v5 = vld [vmem:[#allocation2 + $0x109] sm:$0xff]  ;;  %v701_v10 = vld [vmem:[#allocation2 + $0x112] sm:$0xff] }
 0x188   : > { %1038 = vrot.lane.b32.xlu1 %v3791_v59, %s2983_s10  ;;  %2794 = vmatmul.mubr.msk.f32.gmra.mrb[4].mxu0 %vm2006_vm12, %v1974_v41  ;;  %v1876_v45 = vsel %vm1869_vm8, %v1843_v24, %v1271_v44  ;;  %v3847_v44 = vld [vmem:[#allocation2 + $0x108] sm:$0xff] }
 0x189   : > { %v1147_v63 = vpop.permute.xlu0 %1146 }
 0x18a   : > { %v1399_v31 = vpop.permute.xlu1 %1398  ;;  %v1845_v27 = vsel %vm1836_vm7, %v1812_v62, %v1147_v63  ;;  %v702_v62 = vld [vmem:[#allocation2 + $0x122] sm:$0xff] }
 0x18b   : > { %1548 = vrot.lane.b32.xlu0 %v667_v4, %s2988_s27  ;;  %v1909_v0 = vsel %vm1902_vm10, %v1876_v45, %v1399_v31  ;;  %v3897_v45 = vld [vmem:[#allocation2 + $0x120] sm:$0xff] }
 0x18c   : > { %1546 = vrot.lane.b32.xlu1 %v666_v42, %s2988_s27 }
 0x18d   : > { %v1655_v56 = vpop.permute.xlu0 %1654 }
 0x18e   : > { %v1527_v34 = vpop.permute.xlu1 %1526 }
 0x18f   : > { %v1942_v32 = vsel %vm1935_vm9, %v1909_v0, %v1527_v34  ;;  %1168 = vrot.lane.b32.xlu0 %v667_v4, %s2984_s11  ;;  %v1747_v4 = vsel %vm392_vm3, %v3397_v26, %v3371_v61 }
 0x190   : > { %1166 = vrot.lane.b32.xlu1 %v666_v42, %s2984_s11  ;;  %v1975_v12 = vsel %vm1968_vm11, %v1942_v32, %v1655_v56  ;;  %v1780_v63 = vsel %vm1770_vm5, %v1747_v4, %v3530_v30  ;;  %v3905_v32 = vld [vmem:[#allocation2 + $0x128] sm:$0xff] }
 0x191   : > { %2796 = vmatprep.mubr.msk.f32.mxu0 %vm2006_vm12, %v1975_v12  ;;  %v1275_v14 = vpop.permute.xlu0 %1274  ;;  %v1813_v42 = vsel %vm1803_vm6, %v1780_v63, %v3658_v39  ;;  %v4518_v63 = vld [vmem:[#allocation12_spill] sm:$0xff] }
 0x192   : > { %v1529_v49 = vpop.permute.xlu1 %1528  ;;  %v1878_v51 = vsel %vm1869_vm8, %v1845_v27, %v1275_v14 }
 0x193   : > { %1676 = vrot.lane.b32.xlu0 %v699_v21, %s2987_s26  ;;  %v1943_v8 = vsel %vm1935_vm9, %v1910_v19, %v1529_v49 }
 0x194   : > { %1674 = vrot.lane.b32.xlu1 %v698_v48, %s2987_s26 }
 0x195   : > { %v1277_v1 = vpop.permute.xlu0 %1276 }
 0x196   : > { %v1149_v46 = vpop.permute.xlu1 %1148 }
 0x197   : > { %1422 = vrot.lane.b32.xlu0 %v3847_v44, %s2986_s17  ;;  %v1846_v31 = vsel %vm1836_vm7, %v1813_v42, %v1149_v46 }
 0x198   : > { %1294 = vrot.lane.b32.xlu1 %v698_v48, %s2985_s12  ;;  %v1879_v61 = vsel %vm1869_vm8, %v1846_v31, %v1277_v1  ;;  %v4514_v1 = vld [vmem:[#allocation52_spill] sm:$0xff] }
 0x199   : > { %v1405_v28 = vpop.permute.xlu0 %1404 }
 0x19a   : > { %v1657_v7 = vpop.permute.xlu1 %1656  ;;  %v1912_v26 = vsel %vm1902_vm10, %v1879_v61, %v1405_v28 }
 0x19b   : > { %v1976_v23 = vsel %vm1968_vm11, %v1943_v8, %v1657_v7  ;;  %1424 = vrot.lane.b32.xlu0 %v3854_v9, %s2986_s17 }
 0x19c   : > { %1296 = vrot.lane.b32.xlu1 %v699_v21, %s2985_s12  ;;  %2797 = vmatmul.mubr.msk.f32.gmra.mrb[6].mxu0 %vm2006_vm12, %v1976_v23  ;;  %v1749_v21 = vsel %vm392_vm3, %v3409_v38, %v3383_v17  ;;  %v671_v17 = vld [vmem:[#allocation2 + $0x129] sm:$0xff] }
 0x19d   : > { %v3865_v43 = vpop.permute.xlu0 %1150  ;;  %v1782_v48 = vsel %vm1770_vm5, %v1749_v21, %v3538_v35  ;;  %v1781_v35 = vsel %vm1770_vm5, %v1748_v25, %v3520_v52 }
 0x19e   : > { %v1403_v54 = vpop.permute.xlu1 %1402  ;;  %v1815_v49 = vsel %vm1803_vm6, %v1782_v48, %v3664_v3  ;;  %v1814_v3 = vsel %vm1803_vm6, %v1781_v35, %v4514_v1  ;;  %v705_v1 = vld [vmem:[#allocation2 + $0x142] sm:$0xff] }
 0x19f   : > { %1044 = vrot.lane.b32.xlu0 %v3854_v9, %s2983_s10  ;;  %v1911_v50 = vsel %vm1902_vm10, %v1878_v51, %v1403_v54  ;;  %v1847_v57 = vsel %vm1836_vm7, %v1814_v3, %v3865_v43 }
 0x1a0   : > { %1042 = vrot.lane.b32.xlu1 %v3847_v44, %s2983_s10 }
 0x1a1   : > { %v1659_v60 = vpop.permute.xlu0 %1658 }
 0x1a2   : > { %v1531_v6 = vpop.permute.xlu1 %1530 }
 0x1a3   : > { %v1944_v41 = vsel %vm1935_vm9, %v1911_v50, %v1531_v6  ;;  %1552 = vrot.lane.b32.xlu0 %v669_v33, %s2988_s27  ;;  %v3949_v50 = vld [vmem:[#allocation2 + $0x140] sm:$0xff] }
 0x1a4   : > { %1550 = vrot.lane.b32.xlu1 %v668_v5, %s2988_s27  ;;  %v1977_v29 = vsel %vm1968_vm11, %v1944_v41, %v1659_v60  ;;  %v4515_v41 = vld [vmem:[#allocation13_spill] sm:$0xff] }
 0x1a5   : > { %2799 = vmatprep.mubr.msk.f32.mxu0 %vm2006_vm12, %v1977_v29  ;;  %v1279_v58 = vpop.permute.xlu0 %1278  ;;  %v4516_v29 = vld [vmem:[#allocation19_spill] sm:$0xff] }
 0x1a6   : > { %v1533_v20 = vpop.permute.xlu1 %1532  ;;  %v1880_v2 = vsel %vm1869_vm8, %v1847_v57, %v1279_v58  ;;  %v1751_v58 = vsel %vm392_vm3, %v4516_v29, %v4515_v41 }
 0x1a7   : > { %1172 = vrot.lane.b32.xlu0 %v669_v33, %s2984_s11  ;;  %v1945_v39 = vsel %vm1935_vm9, %v1912_v26, %v1533_v20  ;;  %v640_v33 = vld [vmem:[#allocation2 + $0x138] sm:$0xff] }
 0x1a8   : > { %1170 = vrot.lane.b32.xlu1 %v668_v5, %s2984_s11  ;;  %v4517_v20 = vld [vmem:[#allocation9_spill] sm:$0xff]  ;;  %v4521_v26 = vld [vmem:[#allocation54_spill] sm:$0xff] }
 0x1a9   : > { %v1281_v18 = vpop.permute.xlu0 %1280  ;;  %v1750_v42 = vsel %vm392_vm3, %v4518_v63, %v4517_v20  ;;  %v675_v20 = vld [vmem:[#allocation2 + $0x159] sm:$0xff] }
 0x1aa   : > { %v1153_v24 = vpop.permute.xlu1 %1152 }
 0x1ab   : > { %1680 = vrot.lane.b32.xlu0 %v701_v10, %s2987_s26  ;;  %v1848_v36 = vsel %vm1836_vm7, %v1815_v49, %v1153_v24 }
 0x1ac   : > { %1678 = vrot.lane.b32.xlu1 %v700_v37, %s2987_s26  ;;  %v1881_v55 = vsel %vm1869_vm8, %v1848_v36, %v1281_v18 }
 0x1ad   : > { %v1409_v30 = vpop.permute.xlu0 %1408 }
 0x1ae   : > { %v1661_v56 = vpop.permute.xlu1 %1660  ;;  %v1914_v19 = vsel %vm1902_vm10, %v1881_v55, %v1409_v30  ;;  %v642_v55 = vld [vmem:[#allocation2 + $0x150] sm:$0xff] }
 0x1af   : > { %v1978_v0 = vsel %vm1968_vm11, %v1945_v39, %v1661_v56  ;;  %1426 = vrot.lane.b32.xlu0 %v3897_v45, %s2986_s17  ;;  %v673_v56 = vld [vmem:[#allocation2 + $0x141] sm:$0xff] }
 0x1b0   : > { %1298 = vrot.lane.b32.xlu1 %v700_v37, %s2985_s12  ;;  %2800 = vmatmul.mubr.msk.f32.gmra.mrb[8].mxu0 %vm2006_vm12, %v1978_v0  ;;  %v4520_v37 = vld [vmem:[#allocation32_spill] sm:$0xff] }
 0x1b1   : > { %v1029_v34 = vpop.permute.xlu0 %1028  ;;  %v1783_v24 = vsel %vm1770_vm5, %v1750_v42, %v4520_v37 }
 0x1b2   : > { %v1407_v12 = vpop.permute.xlu1 %1406  ;;  %v1816_v30 = vsel %vm1803_vm6, %v1783_v24, %v4521_v26 }
 0x1b3   : > { %1428 = vrot.lane.b32.xlu0 %v3905_v32, %s2986_s17  ;;  %v1913_v52 = vsel %vm1902_vm10, %v1880_v2, %v1407_v12 }
 0x1b4   : > { %1300 = vrot.lane.b32.xlu1 %v701_v10, %s2985_s12  ;;  %v4519_v10 = vld [vmem:[#allocation35_spill] sm:$0xff] }
 0x1b5   : > { %v1537_v14 = vpop.permute.xlu0 %1536  ;;  %v1784_v31 = vsel %vm1770_vm5, %v1751_v58, %v4519_v10 }
 0x1b6   : > { %v1535_v16 = vpop.permute.xlu1 %1534  ;;  %v1947_v28 = vsel %vm1935_vm9, %v1914_v19, %v1537_v14  ;;  %v1817_v61 = vsel %vm1803_vm6, %v1784_v31, %v1029_v34  ;;  %v672_v14 = vld [vmem:[#allocation2 + $0x139] sm:$0xff]  ;;  %v674_v31 = vld [vmem:[#allocation2 + $0x151] sm:$0xff] }
 0x1b7   : > { %1048 = vrot.lane.b32.xlu0 %v3905_v32, %s2983_s10  ;;  %v1946_v7 = vsel %vm1935_vm9, %v1913_v52, %v1535_v16  ;;  %v643_v52 = vld [vmem:[#allocation2 + $0x158] sm:$0xff] }
 0x1b8   : > { %1046 = vrot.lane.b32.xlu1 %v3897_v45, %s2983_s10 }
 0x1b9   : > { %v1157_v38 = vpop.permute.xlu0 %1156 }
 0x1ba   : > { %v1155_v46 = vpop.permute.xlu1 %1154  ;;  %v1850_v39 = vsel %vm1836_vm7, %v1817_v61, %v1157_v38 }
 0x1bb   : > { %1556 = vrot.lane.b32.xlu0 %v671_v17, %s2988_s27  ;;  %v1849_v0 = vsel %vm1836_vm7, %v1816_v30, %v1155_v46  ;;  %v704_v46 = vld [vmem:[#allocation2 + $0x13a] sm:$0xff] }
 0x1bc   : > { %1554 = vrot.lane.b32.xlu1 %v670_v53, %s2988_s27 }
 0x1bd   : > { %v1665_v8 = vpop.permute.xlu0 %1664 }
 0x1be   : > { %v1980_v23 = vsel %vm1968_vm11, %v1947_v28, %v1665_v8  ;;  %v1663_v15 = vpop.permute.xlu1 %1662 }
 0x1bf   : > { %v1979_v43 = vsel %vm1968_vm11, %v1946_v7, %v1663_v15  ;;  %1176 = vrot.lane.b32.xlu0 %v671_v17, %s2984_s11  ;;  %v4522_v7 = vld [vmem:[#allocation16_spill] sm:$0xff] }
 0x1c0   : > { %1174 = vrot.lane.b32.xlu1 %v670_v53, %s2984_s11  ;;  %2802 = vmatprep.mubr.msk.f32.mxu0 %vm2006_vm12, %v1979_v43 }
 0x1c1   : > { %2803 = vmatmul.mubr.msk.f32.gmra.mrb[10].mxu0 %vm2006_vm12, %v1980_v23  ;;  %v1411_v54 = vpop.permute.xlu0 %1410  ;;  %v4523_v23 = vld [vmem:[#allocation53_spill] sm:$0xff] }
 0x1c2   : > { %v1283_v27 = vpop.permute.xlu1 %1282  ;;  %v1753_v15 = vsel %vm392_vm3, %v4523_v23, %v4522_v7  ;;  %v677_v23 = vld [vmem:[#allocation2 + $0x171] sm:$0xff] }
 0x1c3   : > { %1684 = vrot.lane.b32.xlu0 %v703_v11, %s2987_s26  ;;  %v1882_v48 = vsel %vm1869_vm8, %v1849_v0, %v1283_v27  ;;  %v4526_v27 = vld [vmem:[#allocation37_spill] sm:$0xff] }
 0x1c4   : > { %1682 = vrot.lane.b32.xlu1 %v702_v62, %s2987_s26  ;;  %v1915_v25 = vsel %vm1902_vm10, %v1882_v48, %v1411_v54  ;;  %v4525_v54 = vld [vmem:[#allocation15_spill] sm:$0xff]  ;;  %v707_v0 = vld [vmem:[#allocation2 + $0x15a] sm:$0xff] }
 0x1c5   : > { %v1413_v51 = vpop.permute.xlu0 %1412  ;;  %v644_v48 = vld [vmem:[#allocation2 + $0x168] sm:$0xff] }
 0x1c6   : > { %v1285_v60 = vpop.permute.xlu1 %1284 }
 0x1c7   : > { %1430 = vrot.lane.b32.xlu0 %v640_v33, %s2986_s17  ;;  %v1883_v12 = vsel %vm1869_vm8, %v1850_v39, %v1285_v60  ;;  %v4527_v60 = vld [vmem:[#allocation33_spill] sm:$0xff] }
 0x1c8   : > { %1302 = vrot.lane.b32.xlu1 %v702_v62, %s2985_s12  ;;  %v1916_v16 = vsel %vm1902_vm10, %v1883_v12, %v1413_v51 }
 0x1c9   : > { %v1033_v5 = vpop.permute.xlu0 %1032 }
 0x1ca   : > { %v1031_v6 = vpop.permute.xlu1 %1030 }
 0x1cb   : > { %1432 = vrot.lane.b32.xlu0 %v3949_v50, %s2986_s17 }
 0x1cc   : > { %1304 = vrot.lane.b32.xlu1 %v703_v11, %s2985_s12  ;;  %v4524_v11 = vld [vmem:[#allocation10_spill] sm:$0xff] }
 0x1cd   : > { %v1541_v4 = vpop.permute.xlu0 %1540  ;;  %v1752_v62 = vsel %vm392_vm3, %v4525_v54, %v4524_v11  ;;  %v676_v54 = vld [vmem:[#allocation2 + $0x169] sm:$0xff] }
 0x1ce   : > { %v1539_v18 = vpop.permute.xlu1 %1538  ;;  %v1949_v49 = vsel %vm1935_vm9, %v1916_v16, %v1541_v4  ;;  %v1785_v41 = vsel %vm1770_vm5, %v1752_v62, %v4527_v60 }
 0x1cf   : > { %1052 = vrot.lane.b32.xlu0 %v3949_v50, %s2983_s10  ;;  %v1948_v17 = vsel %vm1935_vm9, %v1915_v25, %v1539_v18  ;;  %v1818_v58 = vsel %vm1803_vm6, %v1785_v41, %v1031_v6 }
 0x1d0   : > { %1050 = vrot.lane.b32.xlu1 %v640_v33, %s2983_s10  ;;  %v1786_v33 = vsel %vm1770_vm5, %v1753_v15, %v4526_v27 }
 0x1d1   : > { %v1161_v21 = vpop.permute.xlu0 %1160  ;;  %v1819_v29 = vsel %vm1803_vm6, %v1786_v33, %v1033_v5 }
 0x1d2   : > { %v1159_v34 = vpop.permute.xlu1 %1158  ;;  %v1852_v4 = vsel %vm1836_vm7, %v1819_v29, %v1161_v21  ;;  %v706_v21 = vld [vmem:[#allocation2 + $0x152] sm:$0xff] }
 0x1d3   : > { %1560 = vrot.lane.b32.xlu0 %v673_v56, %s2988_s27  ;;  %v1851_v63 = vsel %vm1836_vm7, %v1818_v58, %v1159_v34 }
 0x1d4   : > { %1558 = vrot.lane.b32.xlu1 %v672_v14, %s2988_s27 }
 0x1d5   : > { %v1669_v36 = vpop.permute.xlu0 %1668 }
 0x1d6   : > { %v1982_v35 = vsel %vm1968_vm11, %v1949_v49, %v1669_v36  ;;  %v1667_v38 = vpop.permute.xlu1 %1666  ;;  %v645_v49 = vld [vmem:[#allocation2 + $0x170] sm:$0xff] }
 0x1d7   : > { %v1981_v53 = vsel %vm1968_vm11, %v1948_v17, %v1667_v38  ;;  %1180 = vrot.lane.b32.xlu0 %v673_v56, %s2984_s11  ;;  %v4528_v17 = vld [vmem:[#allocation18_spill] sm:$0xff] }
 0x1d8   : > { %1178 = vrot.lane.b32.xlu1 %v672_v14, %s2984_s11  ;;  %2805 = vmatprep.mubr.msk.f32.mxu0 %vm2006_vm12, %v1981_v53  ;;  %v4529_v53 = vld [vmem:[#allocation11_spill] sm:$0xff] }
 0x1d9   : > { %2806 = vmatmul.mubr.msk.f32.gmra.mrb[12].mxu0 %vm2006_vm12, %v1982_v35  ;;  %v1415_v3 = vpop.permute.xlu0 %1414  ;;  %v1755_v35 = vsel %vm392_vm3, %v3691_v22, %v4528_v17 }
 0x1da   : > { %v1287_v57 = vpop.permute.xlu1 %1286 }
 0x1db   : > { %1688 = vrot.lane.b32.xlu0 %v705_v1, %s2987_s26  ;;  %v1884_v18 = vsel %vm1869_vm8, %v1851_v63, %v1287_v57  ;;  %v708_v63 = vld [vmem:[#allocation2 + $0x16a] sm:$0xff] }
 0x1dc   : > { %1686 = vrot.lane.b32.xlu1 %v704_v46, %s2987_s26  ;;  %v1917_v24 = vsel %vm1902_vm10, %v1884_v18, %v1415_v3 }
 0x1dd   : > { %v1417_v2 = vpop.permute.xlu0 %1416 }
 0x1de   : > { %v1289_v19 = vpop.permute.xlu1 %1288 }
 0x1df   : > { %1434 = vrot.lane.b32.xlu0 %v642_v55, %s2986_s17  ;;  %v1885_v42 = vsel %vm1869_vm8, %v1852_v4, %v1289_v19  ;;  %v709_v4 = vld [vmem:[#allocation2 + $0x172] sm:$0xff] }
 0x1e0   : > { %1306 = vrot.lane.b32.xlu1 %v704_v46, %s2985_s12  ;;  %v1918_v5 = vsel %vm1902_vm10, %v1885_v42, %v1417_v2  ;;  %v4531_v46 = vld [vmem:[#allocation39_spill] sm:$0xff]  ;;  %v4532_v2 = vld [vmem:[#allocation34_spill] sm:$0xff] }
 0x1e1   : > { %v1037_v28 = vpop.permute.xlu0 %1036  ;;  %v1788_v57 = vsel %vm1770_vm5, %v1755_v35, %v4531_v46  ;;  %v678_v35 = vld [vmem:[#allocation2 + $0x181] sm:$0xff] }
 0x1e2   : > { %v1035_v8 = vpop.permute.xlu1 %1034 }
 0x1e3   : > { %1436 = vrot.lane.b32.xlu0 %v643_v52, %s2986_s17 }
 0x1e4   : > { %1308 = vrot.lane.b32.xlu1 %v705_v1, %s2985_s12  ;;  %v4530_v1 = vld [vmem:[#allocation55_spill] sm:$0xff] }
 0x1e5   : > { %v1545_v43 = vpop.permute.xlu0 %1544  ;;  %v1754_v3 = vsel %vm392_vm3, %v4530_v1, %v4529_v53 }
 0x1e6   : > { %v1543_v51 = vpop.permute.xlu1 %1542  ;;  %v1951_v6 = vsel %vm1935_vm9, %v1918_v5, %v1545_v43  ;;  %v1787_v19 = vsel %vm1770_vm5, %v1754_v3, %v4532_v2 }
 0x1e7   : > { %1056 = vrot.lane.b32.xlu0 %v643_v52, %s2983_s10  ;;  %v1950_v26 = vsel %vm1935_vm9, %v1917_v24, %v1543_v51  ;;  %v1821_v52 = vsel %vm1803_vm6, %v1788_v57, %v1037_v28  ;;  %v1820_v7 = vsel %vm1803_vm6, %v1787_v19, %v1035_v8  ;;  %v4533_v24 = vld [vmem:[#allocation21_spill] sm:$0xff]  ;;  %v711_v19 = vld [vmem:[#allocation2 + $0x18a] sm:$0xff] }
 0x1e8   : > { %1054 = vrot.lane.b32.xlu1 %v642_v55, %s2983_s10 }
 0x1e9   : > { %v1165_v10 = vpop.permute.xlu0 %1164 }
 0x1ea   : > { %v1163_v37 = vpop.permute.xlu1 %1162  ;;  %v1854_v22 = vsel %vm1836_vm7, %v1821_v52, %v1165_v10  ;;  %v646_v10 = vld [vmem:[#allocation2 + $0x180] sm:$0xff] }
 0x1eb   : > { %1564 = vrot.lane.b32.xlu0 %v675_v20, %s2988_s27  ;;  %v1853_v15 = vsel %vm1836_vm7, %v1820_v7, %v1163_v37  ;;  %v647_v37 = vld [vmem:[#allocation2 + $0x188] sm:$0xff] }
 0x1ec   : > { %1562 = vrot.lane.b32.xlu1 %v674_v31, %s2988_s27  ;;  %v710_v7 = vld [vmem:[#allocation2 + $0x182] sm:$0xff] }
 0x1ed   : > { %v1673_v61 = vpop.permute.xlu0 %1672 }
 0x1ee   : > { %v1984_v30 = vsel %vm1968_vm11, %v1951_v6, %v1673_v61  ;;  %v1671_v39 = vpop.permute.xlu1 %1670  ;;  %v1757_v61 = vsel %vm392_vm3, %v3747_v47, %v4533_v24 }
 0x1ef   : > { %v1983_v56 = vsel %vm1968_vm11, %v1950_v26, %v1671_v39  ;;  %1184 = vrot.lane.b32.xlu0 %v675_v20, %s2984_s11 }
 0x1f0   : > { %1182 = vrot.lane.b32.xlu1 %v674_v31, %s2984_s11  ;;  %2808 = vmatprep.mubr.msk.f32.mxu0 %vm2006_vm12, %v1983_v56  ;;  %v4535_v56 = vld [vmem:[#allocation41_spill] sm:$0xff] }
 0x1f1   : > { %2809 = vmatmul.mubr.msk.f32.gmra.mrb[14].mxu0 %vm2006_vm12, %v1984_v30  ;;  %v1419_v12 = vpop.permute.xlu0 %1418  ;;  %v4534_v30 = vld [vmem:[#allocation14_spill] sm:$0xff] }
 0x1f2   : > { %v1291_v14 = vpop.permute.xlu1 %1290  ;;  %v1756_v39 = vsel %vm392_vm3, %v3734_v40, %v4534_v30 }
 0x1f3   : > { %1692 = vrot.lane.b32.xlu0 %v707_v0, %s2987_s26  ;;  %v1886_v62 = vsel %vm1869_vm8, %v1853_v15, %v1291_v14 }
 0x1f4   : > { %1690 = vrot.lane.b32.xlu1 %v706_v21, %s2987_s26  ;;  %v1919_v33 = vsel %vm1902_vm10, %v1886_v62, %v1419_v12 }
 0x1f5   : > { %v1421_v34 = vpop.permute.xlu0 %1420 }
 0x1f6   : > { %v1293_v16 = vpop.permute.xlu1 %1292 }
 0x1f7   : > { %1438 = vrot.lane.b32.xlu0 %v644_v48, %s2986_s17  ;;  %v1887_v43 = vsel %vm1869_vm8, %v1854_v22, %v1293_v16  ;;  %v679_v16 = vld [vmem:[#allocation2 + $0x189] sm:$0xff] }
 0x1f8   : > { %1310 = vrot.lane.b32.xlu1 %v706_v21, %s2985_s12  ;;  %v1920_v28 = vsel %vm1902_vm10, %v1887_v43, %v1421_v34  ;;  %v4536_v21 = vld [vmem:[#allocation36_spill] sm:$0xff] }
 0x1f9   : > { %v1041_v25 = vpop.permute.xlu0 %1040  ;;  %v1789_v14 = vsel %vm1770_vm5, %v1756_v39, %v4536_v21 }
 0x1fa   : > { %v1039_v36 = vpop.permute.xlu1 %1038 }
 0x1fb   : > { %1440 = vrot.lane.b32.xlu0 %v645_v49, %s2986_s17  ;;  %v1822_v34 = vsel %vm1803_vm6, %v1789_v14, %v1039_v36 }
 0x1fc   : > { %1312 = vrot.lane.b32.xlu1 %v707_v0, %s2985_s12  ;;  %v1790_v0 = vsel %vm1770_vm5, %v1757_v61, %v4535_v56 }
 0x1fd   : > { %v1549_v38 = vpop.permute.xlu0 %1548 }
 0x1fe   : > { %v1547_v55 = vpop.permute.xlu1 %1546  ;;  %v1953_v8 = vsel %vm1935_vm9, %v1920_v28, %v1549_v38  ;;  %v4537_v28 = vld [vmem:[#allocation23_spill] sm:$0xff] }
 0x1ff   : > { %1060 = vrot.lane.b32.xlu0 %v645_v49, %s2983_s10  ;;  %v1952_v60 = vsel %vm1935_vm9, %v1919_v33, %v1547_v55 }
 0x200   : > { %1058 = vrot.lane.b32.xlu1 %v644_v48, %s2983_s10  ;;  %v1823_v48 = vsel %vm1803_vm6, %v1790_v0, %v1041_v25 }
 0x201   : > { %v1169_v11 = vpop.permute.xlu0 %1168 }
 0x202   : > { %v1167_v27 = vpop.permute.xlu1 %1166  ;;  %v1856_v47 = vsel %vm1836_vm7, %v1823_v48, %v1169_v11  ;;  %v680_v11 = vld [vmem:[#allocation2 + $0x199] sm:$0xff]  ;;  %v713_v48 = vld [vmem:[#allocation2 + $0x1a2] sm:$0xff] }
 0x203   : > { %1568 = vrot.lane.b32.xlu0 %v677_v23, %s2988_s27  ;;  %v1855_v40 = vsel %vm1836_vm7, %v1822_v34, %v1167_v27  ;;  %v712_v27 = vld [vmem:[#allocation2 + $0x19a] sm:$0xff] }
 0x204   : > { %1566 = vrot.lane.b32.xlu1 %v676_v54, %s2988_s27 }
 0x205   : > { %v1677_v51 = vpop.permute.xlu0 %1676 }
 0x206   : > { %v1986_v41 = vsel %vm1968_vm11, %v1953_v8, %v1677_v51  ;;  %v1675_v29 = vpop.permute.xlu1 %1674  ;;  %v1759_v8 = vsel %vm392_vm3, %v3801_v13, %v4537_v28  ;;  %v649_v51 = vld [vmem:[#allocation2 + $0x1a0] sm:$0xff] }
 0x207   : > { %1188 = vrot.lane.b32.xlu0 %v677_v23, %s2984_s11  ;;  %v1985_v58 = vsel %vm1968_vm11, %v1952_v60, %v1675_v29  ;;  %v648_v23 = vld [vmem:[#allocation2 + $0x198] sm:$0xff]  ;;  %v4539_v29 = vld [vmem:[#allocation43_spill] sm:$0xff] }
 0x208   : > { %1186 = vrot.lane.b32.xlu1 %v676_v54, %s2984_s11  ;;  %2811 = vmatprep.mubr.msk.f32.mxu1 %vm2006_vm12, %v1985_v58  ;;  %v4538_v60 = vld [vmem:[#allocation17_spill] sm:$0xff]  ;;  %v1792_v58 = vsel %vm1770_vm5, %v1759_v8, %v4539_v29 }
 0x209   : > { %2812 = vmatmul.mubr.msk.f32.vlgmr.msra.gmra.mrb[0].mxu1 %vm2006_vm12, %v1986_v41  ;;  %v1423_v20 = vpop.permute.xlu0 %1422  ;;  %v1758_v41 = vsel %vm392_vm3, %v3791_v59, %v4538_v60 }
 0x20a   : > { %v1295_v42 = vpop.permute.xlu1 %1294 }
 0x20b   : > { %1696 = vrot.lane.b32.xlu0 %v709_v4, %s2987_s26  ;;  %v1888_v38 = vsel %vm1869_vm8, %v1855_v40, %v1295_v42 }
 0x20c   : > { %1694 = vrot.lane.b32.xlu1 %v708_v63, %s2987_s26  ;;  %v1921_v1 = vsel %vm1902_vm10, %v1888_v38, %v1423_v20  ;;  %v4540_v20 = vld [vmem:[#allocation38_spill] sm:$0xff] }
 0x20d   : > { %v1425_v31 = vpop.permute.xlu0 %1424 }
 0x20e   : > { %v1297_v18 = vpop.permute.xlu1 %1296 }
 0x20f   : > { %1442 = vrot.lane.b32.xlu0 %v646_v10, %s2986_s17  ;;  %v1889_v49 = vsel %vm1869_vm8, %v1856_v47, %v1297_v18 }
 0x210   : > { %1314 = vrot.lane.b32.xlu1 %v708_v63, %s2985_s12  ;;  %v1922_v25 = vsel %vm1902_vm10, %v1889_v49, %v1425_v31  ;;  %v1791_v63 = vsel %vm1770_vm5, %v1758_v41, %v4540_v20 }
 0x211   : > { %v1045_v5 = vpop.permute.xlu0 %1044 }
 0x212   : > { %v1043_v6 = vpop.permute.xlu1 %1042  ;;  %v1825_v42 = vsel %vm1803_vm6, %v1792_v58, %v1045_v5 }
 0x213   : > { %1444 = vrot.lane.b32.xlu0 %v647_v37, %s2986_s17  ;;  %v1824_v13 = vsel %vm1803_vm6, %v1791_v63, %v1043_v6 }
 0x214   : > { %1316 = vrot.lane.b32.xlu1 %v709_v4, %s2985_s12 }
 0x215   : > { %v1553_v26 = vpop.permute.xlu0 %1552 }
 0x216   : > { %v1551_v12 = vpop.permute.xlu1 %1550  ;;  %v1955_v36 = vsel %vm1935_vm9, %v1922_v25, %v1553_v26 }
 0x217   : > { %1064 = vrot.lane.b32.xlu0 %v647_v37, %s2983_s10  ;;  %v1954_v46 = vsel %vm1935_vm9, %v1921_v1, %v1551_v12  ;;  %v681_v37 = vld [vmem:[#allocation2 + $0x1a1] sm:$0xff] }
 0x218   : > { %1062 = vrot.lane.b32.xlu1 %v646_v10, %s2983_s10 }
 0x219   : > { %v1173_v17 = vpop.permute.xlu0 %1172 }
 0x21a   : > { %v1171_v53 = vpop.permute.xlu1 %1170  ;;  %v1858_v10 = vsel %vm1836_vm7, %v1825_v42, %v1173_v17 }
 0x21b   : > { %1572 = vrot.lane.b32.xlu0 %v679_v16, %s2988_s27  ;;  %v1857_v59 = vsel %vm1836_vm7, %v1824_v13, %v1171_v53 }
 0x21c   : > { %1570 = vrot.lane.b32.xlu1 %v678_v35, %s2988_s27 }
 0x21d   : > { %v1681_v3 = vpop.permute.xlu0 %1680 }
 0x21e   : > { %v1988_v57 = vsel %vm1968_vm11, %v1955_v36, %v1681_v3  ;;  %v1679_v55 = vpop.permute.xlu1 %1678 }
 0x21f   : > { %v1987_v2 = vsel %vm1968_vm11, %v1954_v46, %v1679_v55  ;;  %1192 = vrot.lane.b32.xlu0 %v679_v16, %s2984_s11 }
 0x220   : > { %1190 = vrot.lane.b32.xlu1 %v678_v35, %s2984_s11  ;;  %2814 = vmatprep.mubr.msk.f32.mxu1 %vm2006_vm12, %v1987_v2  ;;  %v4542_v2 = vld [vmem:[#allocation25_spill] sm:$0xff] }
 0x221   : > { %2815 = vmatmul.mubr.msk.f32.gmra.mrb[2].mxu1 %vm2006_vm12, %v1988_v57  ;;  %v1427_v52 = vpop.permute.xlu0 %1426  ;;  %v4541_v57 = vld [vmem:[#allocation20_spill] sm:$0xff] }
 0x222   : > { %v1299_v22 = vpop.permute.xlu1 %1298  ;;  %v1760_v55 = vsel %vm392_vm3, %v3847_v44, %v4541_v57 }
 0x223   : > { %1700 = vrot.lane.b32.xlu0 %v711_v19, %s2987_s26  ;;  %v1890_v24 = vsel %vm1869_vm8, %v1857_v59, %v1299_v22 }
 0x224   : > { %1698 = vrot.lane.b32.xlu1 %v710_v7, %s2987_s26  ;;  %v1923_v0 = vsel %vm1902_vm10, %v1890_v24, %v1427_v52 }
 0x225   : > { %v1429_v15 = vpop.permute.xlu0 %1428 }
 0x226   : > { %v1301_v43 = vpop.permute.xlu1 %1300 }
 0x227   : > { %1446 = vrot.lane.b32.xlu0 %v648_v23, %s2986_s17  ;;  %v1891_v31 = vsel %vm1869_vm8, %v1858_v10, %v1301_v43  ;;  %v4544_v23 = vld [vmem:[#allocation45_spill] sm:$0xff] }
 0x228   : > { %1318 = vrot.lane.b32.xlu1 %v710_v7, %s2985_s12  ;;  %v1924_v5 = vsel %vm1902_vm10, %v1891_v31, %v1429_v15  ;;  %v4543_v7 = vld [vmem:[#allocation40_spill] sm:$0xff] }
 0x229   : > { %v1049_v54 = vpop.permute.xlu0 %1048  ;;  %v1793_v22 = vsel %vm1770_vm5, %v1760_v55, %v4543_v7 }
 0x22a   : > { %v1047_v62 = vpop.permute.xlu1 %1046 }
 0x22b   : > { %1574 = vrot.lane.b32.xlu0 %v680_v11, %s2988_s27 }
 0x22c   : > { %1320 = vrot.lane.b32.xlu1 %v711_v19, %s2985_s12  ;;  %v1761_v19 = vsel %vm392_vm3, %v3854_v9, %v4542_v2 }
 0x22d   : > { %v1557_v33 = vpop.permute.xlu0 %1556  ;;  %v1794_v15 = vsel %vm1770_vm5, %v1761_v19, %v4544_v23 }
 0x22e   : > { %v1555_v4 = vpop.permute.xlu1 %1554  ;;  %v1957_v56 = vsel %vm1935_vm9, %v1924_v5, %v1557_v33  ;;  %v1827_v11 = vsel %vm1803_vm6, %v1794_v15, %v1049_v54 }
 0x22f   : > { %1702 = vrot.lane.b32.xlu0 %v712_v27, %s2987_s26  ;;  %v1956_v34 = vsel %vm1935_vm9, %v1923_v0, %v1555_v4  ;;  %v1826_v27 = vsel %vm1803_vm6, %v1793_v22, %v1047_v62 }
 0x230   : > { %1448 = vrot.lane.b32.xlu1 %v649_v51, %s2986_s17 }
 0x231   : > { %v1177_v18 = vpop.permute.xlu0 %1176 }
 0x232   : > { %v1175_v61 = vpop.permute.xlu1 %1174  ;;  %v1860_v8 = vsel %vm1836_vm7, %v1827_v11, %v1177_v18 }
 0x233   : > { %v2789_v26 = vpop.f32.mrb[0].mxu0  ;;  %v1859_v44 = vsel %vm1836_vm7, %v1826_v27, %v1175_v61 }
 0x234   : > { %2333 = vst.msk [vmem:[%s3053_s7 + $0x8] sm:$0xff] %vm1770_vm5, %v2789_v26  ;;  %v2366_v6 = vsel %vm1770_vm5, %v2789_v26, 0.0  ;;  %v2439_v30 = vmul.f32 %v2789_v26, %v2789_v26  ;;  %v2173_v39 = vpop.f32.mrb[1].mxu0  ;;  %1576 = vrot.lane.b32.xlu1 %v681_v37, %s2988_s27 }
 0x235   : > { %2332 = vst.msk [vmem:[%s3053_s7] sm:$0xff] %vm1770_vm5, %v2173_v39  ;;  %v2365_v12 = vsel %vm1770_vm5, %v2173_v39, 0.0  ;;  %v2438_v21 = vmul.f32 %v2173_v39, %v2173_v39  ;;  %v1685_v14 = vpop.permute.xlu0 %1684 }
 0x236   : > { %v2471_v47 = vsel %vm1770_vm5, %v2439_v30, 0.0  ;;  %v2367_v16 = vadd.f32 %v2366_v6, %v2365_v12  ;;  %v1990_v40 = vsel %vm1968_vm11, %v1957_v56, %v1685_v14  ;;  %v1683_v49 = vpop.permute.xlu1 %1682 }
 0x237   : > { %v2470_v17 = vsel %vm1770_vm5, %v2438_v21, 0.0  ;;  %v1989_v35 = vsel %vm1968_vm11, %v1956_v34, %v1683_v49 }
 0x238   : > { %v2472_v38 = vadd.f32 %v2471_v47, %v2470_v17  ;;  %1704 = vrot.lane.b32.xlu1 %v713_v48, %s2987_s26  ;;  %2817 = vmatprep.mubr.msk.f32.mxu1 %vm2006_vm12, %v1989_v35  ;;  %v4545_v48 = vld [vmem:[#allocation27_spill] sm:$0xff]  ;;  %v4546_v17 = vld [vmem:[#allocation22_spill] sm:$0xff] }
 0x239   : > { %2818 = vmatmul.mubr.msk.f32.gmra.mrb[4].mxu1 %vm2006_vm12, %v1990_v40  ;;  %v1431_v53 = vpop.permute.xlu0 %1430  ;;  %v1763_v34 = vsel %vm392_vm3, %v3905_v32, %v4545_v48  ;;  %v1762_v35 = vsel %vm392_vm3, %v3897_v45, %v4546_v17 }
 0x23a   : > { %v1303_v25 = vpop.permute.xlu1 %1302 }
 0x23b   : > { %v1892_v54 = vsel %vm1869_vm8, %v1859_v44, %v1303_v25 }
 0x23c   : > { %v1925_v59 = vsel %vm1902_vm10, %v1892_v54, %v1431_v53 }
 0x23d   : > { %v1433_v36 = vpop.permute.xlu0 %1432 }
 0x23e   : > { %v1305_v1 = vpop.permute.xlu1 %1304 }
 0x23f   : > { %v1893_v33 = vsel %vm1869_vm8, %v1860_v8, %v1305_v1  ;;  %v4548_v1 = vld [vmem:[#allocation42_spill] sm:$0xff] }
 0x240   : > { %v1926_v63 = vsel %vm1902_vm10, %v1893_v33, %v1433_v36  ;;  %v1795_v57 = vsel %vm1770_vm5, %v1762_v35, %v4548_v1 }
 0x241   : > { %v1053_v3 = vpop.permute.xlu0 %1052 }
 0x242   : > { %v4136_v46 = vpop.permute.xlu1 %1050 }
 0x243   : > { %v1828_v19 = vsel %vm1803_vm6, %v1795_v57, %v4136_v46 }
 0x245   : > { %v1561_v52 = vpop.permute.xlu0 %1560 }
 0x246   : > { %v1559_v43 = vpop.permute.xlu1 %1558  ;;  %v1959_v10 = vsel %vm1935_vm9, %v1926_v63, %v1561_v52 }
 0x247   : > { %v2792_v28 = vpop.f32.mrb[2].mxu0  ;;  %v1958_v37 = vsel %vm1935_vm9, %v1925_v59, %v1559_v43 }
 0x248   : > { %2335 = vst.msk [vmem:[%s3053_s7 + $0x18] sm:$0xff] %vm1770_vm5, %v2792_v28  ;;  %v2183_v9 = vpop.f32.mrb[3].mxu0  ;;  %v2441_v51 = vmul.f32 %v2792_v28, %v2792_v28  ;;  %v2370_v4 = vsel %vm1770_vm5, %v2792_v28, 0.0 }
 0x249   : > { %2334 = vst.msk [vmem:[%s3053_s7 + $0x10] sm:$0xff] %vm1770_vm5, %v2183_v9  ;;  %v2368_v60 = vsel %vm1770_vm5, %v2183_v9, 0.0  ;;  %v2440_v41 = vmul.f32 %v2183_v9, %v2183_v9  ;;  %v1181_v29 = vpop.permute.xlu0 %1180 }
 0x24a   : > { %v2369_v62 = vadd.f32 %v2368_v60, %v2367_v16  ;;  %v1179_v58 = vpop.permute.xlu1 %1178  ;;  %v2475_v31 = vsel %vm1770_vm5, %v2441_v51, 0.0 }
 0x24b   : > { %v2473_v20 = vsel %vm1770_vm5, %v2440_v41, 0.0  ;;  %v1861_v22 = vsel %vm1836_vm7, %v1828_v19, %v1179_v58 }
 0x24c   : > { %v2474_v42 = vadd.f32 %v2473_v20, %v2472_v38  ;;  %v2371_v13 = vadd.f32 %v2370_v4, %v2369_v62  ;;  %v4547_v38 = vld [vmem:[#allocation47_spill] sm:$0xff] }
 0x24d   : > { %v1689_v18 = vpop.permute.xlu0 %1688  ;;  %v1796_v53 = vsel %vm1770_vm5, %v1763_v34, %v4547_v38 }
 0x24e   : > { %v1992_v24 = vsel %vm1968_vm11, %v1959_v10, %v1689_v18  ;;  %v1687_v61 = vpop.permute.xlu1 %1686  ;;  %v2476_v26 = vadd.f32 %v2475_v31, %v2474_v42  ;;  %v1829_v32 = vsel %vm1803_vm6, %v1796_v53, %v1053_v3  ;;  %v451_v31 = vld [vmem:[#allocation2 + $0x138] sm:$0xff] }
 0x24f   : > { %v1991_v5 = vsel %vm1968_vm11, %v1958_v37, %v1687_v61  ;;  %v1862_v52 = vsel %vm1836_vm7, %v1829_v32, %v1181_v29 }
 0x250   : > { %2820 = vmatprep.mubr.msk.f32.mxu1 %vm2006_vm12, %v1991_v5 }
 0x251   : > { %2821 = vmatmul.mubr.msk.f32.gmra.mrb[6].mxu1 %vm2006_vm12, %v1992_v24  ;;  %v1435_v6 = vpop.permute.xlu0 %1434 }
 0x252   : > { %v1307_v30 = vpop.permute.xlu1 %1306 }
 0x253   : > { %v1894_v3 = vsel %vm1869_vm8, %v1861_v22, %v1307_v30 }
 0x254   : > { %v1927_v8 = vsel %vm1902_vm10, %v1894_v3, %v1435_v6 }
 0x255   : > { %v1437_v39 = vpop.permute.xlu0 %1436 }
 0x256   : > { %v1309_v56 = vpop.permute.xlu1 %1308 }
 0x257   : > { %v1895_v23 = vsel %vm1869_vm8, %v1862_v52, %v1309_v56 }
 0x258   : > { %v1928_v28 = vsel %vm1902_vm10, %v1895_v23, %v1437_v39  ;;  %v4550_v39 = vld [vmem:[#allocation24_spill] sm:$0xff] }
 0x259   : > { %v4170_v0 = vpop.permute.xlu0 %1056  ;;  %v1764_v56 = vsel %vm392_vm3, %v451_v31, %v4550_v39 }
 0x25a   : > { %v4172_v12 = vpop.permute.xlu1 %1054 }
 0x25b   : > { %v2795_v21 = vpop.f32.mrb[4].mxu0 }
 0x25c   : > { %2337 = vst.msk [vmem:[%s3053_s7 + $0x28] sm:$0xff] %vm1770_vm5, %v2795_v21  ;;  %v2193_v14 = vpop.f32.mrb[5].mxu0  ;;  %v2443_v47 = vmul.f32 %v2795_v21, %v2795_v21  ;;  %v2374_v55 = vsel %vm1770_vm5, %v2795_v21, 0.0  ;;  %v4551_v21 = vld [vmem:[#allocation49_spill] sm:$0xff] }
 0x25d   : > { %2336 = vst.msk [vmem:[%s3053_s7 + $0x20] sm:$0xff] %vm1770_vm5, %v2193_v14  ;;  %v2372_v16 = vsel %vm1770_vm5, %v2193_v14, 0.0  ;;  %v2442_v40 = vmul.f32 %v2193_v14, %v2193_v14  ;;  %v1565_v49 = vpop.permute.xlu0 %1564 }
 0x25e   : > { %v2373_v25 = vadd.f32 %v2372_v16, %v2371_v13  ;;  %v1563_v36 = vpop.permute.xlu1 %1562  ;;  %v2479_v15 = vsel %vm1770_vm5, %v2443_v47, 0.0  ;;  %v1961_v46 = vsel %vm1935_vm9, %v1928_v28, %v1565_v49  ;;  %v4552_v47 = vld [vmem:[#allocation44_spill] sm:$0xff] }
 0x25f   : > { %v2477_v2 = vsel %vm1770_vm5, %v2442_v40, 0.0  ;;  %v1960_v9 = vsel %vm1935_vm9, %v1927_v8, %v1563_v36  ;;  %v1797_v16 = vsel %vm1770_vm5, %v1764_v56, %v4552_v47 }
 0x260   : > { %v2478_v45 = vadd.f32 %v2477_v2, %v2476_v26  ;;  %v2375_v7 = vadd.f32 %v2374_v55, %v2373_v25  ;;  %v4549_v26 = vld [vmem:[#allocation29_spill] sm:$0xff] }
 0x261   : > { %v1185_v43 = vpop.permute.xlu0 %1184  ;;  %v1765_v5 = vsel %vm392_vm3, %v3949_v50, %v4549_v26  ;;  %v1830_v50 = vsel %vm1803_vm6, %v1797_v16, %v4172_v12 }
 0x262   : > { %v1183_v11 = vpop.permute.xlu1 %1182  ;;  %v2480_v27 = vadd.f32 %v2479_v15, %v2478_v45  ;;  %v1798_v14 = vsel %vm1770_vm5, %v1765_v5, %v4551_v21 }
 0x263   : > { %v1831_v40 = vsel %vm1803_vm6, %v1798_v14, %v4170_v0  ;;  %v1863_v17 = vsel %vm1836_vm7, %v1830_v50, %v1183_v11 }
 0x264   : > { %v1864_v49 = vsel %vm1836_vm7, %v1831_v40, %v1185_v43 }
 0x265   : > { %v1693_v44 = vpop.permute.xlu0 %1692 }
 0x266   : > { %v1994_v33 = vsel %vm1968_vm11, %v1961_v46, %v1693_v44  ;;  %v1691_v51 = vpop.permute.xlu1 %1690 }
 0x267   : > { %v1993_v60 = vsel %vm1968_vm11, %v1960_v9, %v1691_v51  ;;  %v454_v51 = vld [vmem:[#allocation2 + $0x158] sm:$0xff] }
 0x268   : > { %2823 = vmatprep.mubr.msk.f32.mxu1 %vm2006_vm12, %v1993_v60 }
 0x269   : > { %2824 = vmatmul.mubr.msk.f32.gmra.mrb[8].mxu1 %vm2006_vm12, %v1994_v33  ;;  %v1439_v41 = vpop.permute.xlu0 %1438  ;;  %v453_v33 = vld [vmem:[#allocation2 + $0x150] sm:$0xff] }
 0x26a   : > { %v1311_v29 = vpop.permute.xlu1 %1310 }
 0x26b   : > { %v1896_v53 = vsel %vm1869_vm8, %v1863_v17, %v1311_v29  ;;  %v4553_v29 = vld [vmem:[#allocation26_spill] sm:$0xff] }
 0x26c   : > { %v1929_v0 = vsel %vm1902_vm10, %v1896_v53, %v1439_v41 }
 0x26d   : > { %v1441_v54 = vpop.permute.xlu0 %1440 }
 0x26e   : > { %v1313_v62 = vpop.permute.xlu1 %1312 }
 0x26f   : > { %v2798_v58 = vpop.f32.mrb[6].mxu0  ;;  %v1897_v35 = vsel %vm1869_vm8, %v1864_v49, %v1313_v62  ;;  %v4554_v62 = vld [vmem:[#allocation30_spill] sm:$0xff] }
 0x270   : > { %2339 = vst.msk [vmem:[%s3053_s7 + $0x38] sm:$0xff] %vm1770_vm5, %v2798_v58  ;;  %v2203_v4 = vpop.f32.mrb[7].mxu0  ;;  %v2445_v20 = vmul.f32 %v2798_v58, %v2798_v58  ;;  %v2378_v18 = vsel %vm1770_vm5, %v2798_v58, 0.0  ;;  %v1930_v36 = vsel %vm1902_vm10, %v1897_v35, %v1441_v54  ;;  %v1766_v54 = vsel %vm392_vm3, %v453_v33, %v4553_v29 }
 0x271   : > { %2338 = vst.msk [vmem:[%s3053_s7 + $0x30] sm:$0xff] %vm1770_vm5, %v2203_v4  ;;  %v2376_v63 = vsel %vm1770_vm5, %v2203_v4, 0.0  ;;  %v2444_v42 = vmul.f32 %v2203_v4, %v2203_v4  ;;  %v4212_v13 = vpop.permute.xlu0 %1060  ;;  %v1767_v58 = vsel %vm392_vm3, %v454_v51, %v4554_v62 }
 0x272   : > { %v2377_v10 = vadd.f32 %v2376_v63, %v2375_v7  ;;  %v1059_v59 = vpop.permute.xlu1 %1058  ;;  %v2483_v6 = vsel %vm1770_vm5, %v2445_v20, 0.0  ;;  %v4555_v20 = vld [vmem:[#allocation46_spill] sm:$0xff] }
 0x273   : > { %v2481_v37 = vsel %vm1770_vm5, %v2444_v42, 0.0  ;;  %v1799_v63 = vsel %vm1770_vm5, %v1766_v54, %v4555_v20  ;;  %v4556_v42 = vld [vmem:[#allocation50_spill] sm:$0xff] }
 0x274   : > { %v2482_v24 = vadd.f32 %v2481_v37, %v2480_v27  ;;  %v2379_v61 = vadd.f32 %v2378_v18, %v2377_v10  ;;  %v1800_v10 = vsel %vm1770_vm5, %v1767_v58, %v4556_v42  ;;  %v1832_v37 = vsel %vm1803_vm6, %v1799_v63, %v1059_v59 }
 0x275   : > { %v1569_v30 = vpop.permute.xlu0 %1568  ;;  %v1833_v18 = vsel %vm1803_vm6, %v1800_v10, %v4212_v13 }
 0x276   : > { %v1567_v48 = vpop.permute.xlu1 %1566  ;;  %v2484_v34 = vadd.f32 %v2483_v6, %v2482_v24  ;;  %v1963_v1 = vsel %vm1935_vm9, %v1930_v36, %v1569_v30 }
 0x277   : > { %v1962_v12 = vsel %vm1935_vm9, %v1929_v0, %v1567_v48 }
 0x279   : > { %v1189_v38 = vpop.permute.xlu0 %1188 }
 0x27a   : > { %v1187_v25 = vpop.permute.xlu1 %1186  ;;  %v1866_v24 = vsel %vm1836_vm7, %v1833_v18, %v1189_v38 }
 0x27d   : > { %v1697_v57 = vpop.permute.xlu0 %1696 }
 0x27e   : > { %v1996_v32 = vsel %vm1968_vm11, %v1963_v1, %v1697_v57  ;;  %v1695_v55 = vpop.permute.xlu1 %1694 }
 0x27f   : > { %v1995_v2 = vsel %vm1968_vm11, %v1962_v12, %v1695_v55  ;;  %v4558_v12 = vld [vmem:[#allocation48_spill] sm:$0xff] }
 0x280   : > { %2826 = vmatprep.mubr.msk.f32.mxu1 %vm2006_vm12, %v1995_v2 }
 0x281   : > { %2827 = vmatmul.mubr.msk.f32.gmra.mrb[10].mxu1 %vm2006_vm12, %v1996_v32  ;;  %v1443_v19 = vpop.permute.xlu0 %1442 }
 0x282   : > { %v1315_v52 = vpop.permute.xlu1 %1314 }
 0x283   : > { %v2801_v45 = vpop.f32.mrb[8].mxu0 }
 0x284   : > { %2341 = vst.msk [vmem:[%s3053_s7 + $0x48] sm:$0xff] %vm1770_vm5, %v2801_v45  ;;  %v2213_v7 = vpop.f32.mrb[9].mxu0  ;;  %v2447_v22 = vmul.f32 %v2801_v45, %v2801_v45  ;;  %v2382_v27 = vsel %vm1770_vm5, %v2801_v45, 0.0 }
 0x285   : > { %2340 = vst.msk [vmem:[%s3053_s7 + $0x40] sm:$0xff] %vm1770_vm5, %v2213_v7  ;;  %v2380_v23 = vsel %vm1770_vm5, %v2213_v7, 0.0  ;;  %v2446_v15 = vmul.f32 %v2213_v7, %v2213_v7  ;;  %v1445_v43 = vpop.permute.xlu0 %1444 }
 0x286   : > { %v2381_v3 = vadd.f32 %v2380_v23, %v2379_v61  ;;  %v1317_v11 = vpop.permute.xlu1 %1316  ;;  %v2487_v44 = vsel %vm1770_vm5, %v2447_v22, 0.0  ;;  %v1865_v61 = vsel %vm1836_vm7, %v1832_v37, %v1187_v25  ;;  %v4557_v25 = vld [vmem:[#allocation28_spill] sm:$0xff] }
 0x287   : > { %v2485_v28 = vsel %vm1770_vm5, %v2446_v15, 0.0  ;;  %v1898_v26 = vsel %vm1869_vm8, %v1865_v61, %v1315_v52  ;;  %v1899_v5 = vsel %vm1869_vm8, %v1866_v24, %v1317_v11 }
 0x288   : > { %v2486_v46 = vadd.f32 %v2485_v28, %v2484_v34  ;;  %v2383_v8 = vadd.f32 %v2382_v27, %v2381_v3  ;;  %v1932_v39 = vsel %vm1902_vm10, %v1899_v5, %v1445_v43  ;;  %v1931_v56 = vsel %vm1902_vm10, %v1898_v26, %v1443_v19  ;;  %v455_v34 = vld [vmem:[#allocation2 + $0x168] sm:$0xff]  ;;  %v456_v43 = vld [vmem:[#allocation2 + $0x170] sm:$0xff] }
 0x289   : > { %v4250_v9 = vpop.permute.xlu0 %1064  ;;  %v1768_v36 = vsel %vm392_vm3, %v455_v34, %v4557_v25 }
 0x28a   : > { %v1063_v60 = vpop.permute.xlu1 %1062  ;;  %v2488_v41 = vadd.f32 %v2487_v44, %v2486_v46  ;;  %v1801_v32 = vsel %vm1770_vm5, %v1768_v36, %v4558_v12  ;;  %v4559_v46 = vld [vmem:[#allocation31_spill] sm:$0xff] }
 0x28b   : > { %v1834_v19 = vsel %vm1803_vm6, %v1801_v32, %v1063_v60  ;;  %v4560_v44 = vld [vmem:[#allocation51_spill] sm:$0xff] }
 0x28d   : > { %v1573_v4 = vpop.permute.xlu0 %1572 }
 0x28e   : > { %v1571_v31 = vpop.permute.xlu1 %1570  ;;  %v1965_v13 = vsel %vm1935_vm9, %v1932_v39, %v1573_v4 }
 0x28f   : > { %v1964_v59 = vsel %vm1935_vm9, %v1931_v56, %v1571_v31 }
 0x291   : > { %v1193_v6 = vpop.permute.xlu0 %1192 }
 0x292   : > { %v1191_v30 = vpop.permute.xlu1 %1190 }
 0x293   : > { %v1867_v45 = vsel %vm1836_vm7, %v1834_v19, %v1191_v30 }
 0x294   : > { %v2804_v21 = vpop.f32.mrb[10].mxu0 }
 0x295   : > { %2343 = vst.msk [vmem:[%s3053_s7 + $0x58] sm:$0xff] %vm1770_vm5, %v2804_v21  ;;  %v2223_v14 = vpop.f32.mrb[11].mxu0  ;;  %v1701_v48 = vpop.permute.xlu0 %1700  ;;  %v2449_v47 = vmul.f32 %v2804_v21, %v2804_v21  ;;  %v2386_v38 = vsel %vm1770_vm5, %v2804_v21, 0.0 }
 0x296   : > { %2342 = vst.msk [vmem:[%s3053_s7 + $0x50] sm:$0xff] %vm1770_vm5, %v2223_v14  ;;  %v2384_v16 = vsel %vm1770_vm5, %v2223_v14, 0.0  ;;  %v2448_v40 = vmul.f32 %v2223_v14, %v2223_v14  ;;  %v1998_v50 = vsel %vm1968_vm11, %v1965_v13, %v1701_v48  ;;  %v1699_v49 = vpop.permute.xlu1 %1698 }
 0x297   : > { %v2385_v17 = vadd.f32 %v2384_v16, %v2383_v8  ;;  %v1997_v35 = vsel %vm1968_vm11, %v1964_v59, %v1699_v49  ;;  %v2491_v55 = vsel %vm1770_vm5, %v2449_v47, 0.0  ;;  %v1769_v8 = vsel %vm392_vm3, %v456_v43, %v4559_v46 }
 0x298   : > { %v2489_v53 = vsel %vm1770_vm5, %v2448_v40, 0.0  ;;  %2829 = vmatprep.mubr.msk.f32.mxu1 %vm2006_vm12, %v1997_v35  ;;  %v1802_v33 = vsel %vm1770_vm5, %v1769_v8, %v4560_v44 }
 0x299   : > { %v2490_v1 = vadd.f32 %v2489_v53, %v2488_v41  ;;  %2830 = vmatmul.mubr.msk.f32.gmra.mrb[12].mxu1 %vm2006_vm12, %v1998_v50  ;;  %v1447_v0 = vpop.permute.xlu0 %1446  ;;  %v2387_v57 = vadd.f32 %v2386_v38, %v2385_v17  ;;  %v1835_v51 = vsel %vm1803_vm6, %v1802_v33, %v4250_v9 }
 0x29a   : > { %v1319_v2 = vpop.permute.xlu1 %1318  ;;  %v1868_v41 = vsel %vm1836_vm7, %v1835_v51, %v1193_v6 }
 0x29b   : > { %v2492_v52 = vadd.f32 %v2491_v55, %v2490_v1  ;;  %v1900_v7 = vsel %vm1869_vm8, %v1867_v45, %v1319_v2 }
 0x29c   : > { %v1933_v15 = vsel %vm1902_vm10, %v1900_v7, %v1447_v0 }
 0x29d   : > { %v1575_v22 = vpop.permute.xlu0 %1574 }
 0x29e   : > { %v1321_v23 = vpop.permute.xlu1 %1320  ;;  %v1966_v3 = vsel %vm1935_vm9, %v1933_v15, %v1575_v22 }
 0x29f   : > { %v1901_v29 = vsel %vm1869_vm8, %v1868_v41, %v1321_v23 }
 0x2a1   : > { %v1703_v11 = vpop.permute.xlu0 %1702 }
 0x2a2   : > { %v1999_v27 = vsel %vm1968_vm11, %v1966_v3, %v1703_v11  ;;  %v1449_v28 = vpop.permute.xlu1 %1448 }
 0x2a3   : > { %2832 = vmatprep.mubr.msk.f32.mxu1 %vm2006_vm12, %v1999_v27  ;;  %v1934_v54 = vsel %vm1902_vm10, %v1901_v29, %v1449_v28 }
 0x2a6   : > { %v1577_v60 = vpop.permute.xlu1 %1576 }
 0x2a7   : > { %v1967_v62 = vsel %vm1935_vm9, %v1934_v54, %v1577_v60 }
 0x2aa   : > { %v1705_v58 = vpop.permute.xlu1 %1704 }
 0x2ab   : > { %v2000_v4 = vsel %vm1968_vm11, %v1967_v62, %v1705_v58 }
 0x2ac   : > { %v2807_v20 = vpop.f32.mrb[12].mxu0  ;;  %2833 = vmatmul.mubr.msk.f32.gmra.mrb[14].mxu1 %vm2006_vm12, %v2000_v4 }
 0x2ad   : > { %2345 = vst.msk [vmem:[%s3053_s7 + $0x68] sm:$0xff] %vm1770_vm5, %v2807_v20  ;;  %v2233_v63 = vpop.f32.mrb[13].mxu0  ;;  %v2451_v9 = vmul.f32 %v2807_v20, %v2807_v20  ;;  %v2390_v18 = vsel %vm1770_vm5, %v2807_v20, 0.0 }
 0x2ae   : > { %2344 = vst.msk [vmem:[%s3053_s7 + $0x60] sm:$0xff] %vm1770_vm5, %v2233_v63  ;;  %v2388_v42 = vsel %vm1770_vm5, %v2233_v63, 0.0  ;;  %v2450_v10 = vmul.f32 %v2233_v63, %v2233_v63 }
 0x2af   : > { %v2389_v31 = vadd.f32 %v2388_v42, %v2387_v57  ;;  %v2495_v26 = vsel %vm1770_vm5, %v2451_v9, 0.0 }
 0x2b0   : > { %v2493_v37 = vsel %vm1770_vm5, %v2450_v10, 0.0 }
 0x2b1   : > { %v2494_v24 = vadd.f32 %v2493_v37, %v2492_v52  ;;  %v2391_v61 = vadd.f32 %v2390_v18, %v2389_v31 }
 0x2b3   : > { %v2496_v5 = vadd.f32 %v2495_v26, %v2494_v24 }
 0x2c4   : > { %v2810_v6 = vpop.f32.mrb[14].mxu0 }
 0x2c5   : > { %2347 = vst.msk [vmem:[%s3053_s7 + $0x78] sm:$0xff] %vm1770_vm5, %v2810_v6  ;;  %v2243_v30 = vpop.f32.mrb[15].mxu0  ;;  %v2453_v39 = vmul.f32 %v2810_v6, %v2810_v6  ;;  %v2394_v59 = vsel %vm1770_vm5, %v2810_v6, 0.0 }
 0x2c6   : > { %2346 = vst.msk [vmem:[%s3053_s7 + $0x70] sm:$0xff] %vm1770_vm5, %v2243_v30  ;;  %v2392_v56 = vsel %vm1770_vm5, %v2243_v30, 0.0  ;;  %v2452_v21 = vmul.f32 %v2243_v30, %v2243_v30 }
 0x2c7   : > { %v2393_v13 = vadd.f32 %v2392_v56, %v2391_v61  ;;  %v2499_v47 = vsel %vm1770_vm5, %v2453_v39, 0.0 }
 0x2c8   : > { %v2497_v14 = vsel %vm1770_vm5, %v2452_v21, 0.0 }
 0x2c9   : > { %v2395_v48 = vadd.f32 %v2394_v59, %v2393_v13  ;;  %v2498_v34 = vadd.f32 %v2497_v14, %v2496_v5 }
 0x2cb   : > { %v2500_v16 = vadd.f32 %v2499_v47, %v2498_v34 }
 0x2dc   : > { %v2813_v40 = vpop.f32.mrb[0].mxu1 }
 0x2dd   : > { %2349 = vst.msk [vmem:[%s3053_s7 + $0x88] sm:$0xff] %vm1770_vm5, %v2813_v40  ;;  %v2253_v50 = vpop.f32.mrb[1].mxu1  ;;  %v2455_v49 = vmul.f32 %v2813_v40, %v2813_v40  ;;  %v2398_v53 = vsel %vm1770_vm5, %v2813_v40, 0.0 }
 0x2de   : > { %2348 = vst.msk [vmem:[%s3053_s7 + $0x80] sm:$0xff] %vm1770_vm5, %v2253_v50  ;;  %v2396_v17 = vsel %vm1770_vm5, %v2253_v50, 0.0  ;;  %v2454_v35 = vmul.f32 %v2253_v50, %v2253_v50 }
 0x2df   : > { %v2397_v38 = vadd.f32 %v2396_v17, %v2395_v48  ;;  %v2503_v0 = vsel %vm1770_vm5, %v2455_v49, 0.0 }
 0x2e0   : > { %v2501_v25 = vsel %vm1770_vm5, %v2454_v35, 0.0 }
 0x2e1   : > { %v2502_v36 = vadd.f32 %v2501_v25, %v2500_v16  ;;  %v2399_v1 = vadd.f32 %v2398_v53, %v2397_v38 }
 0x2e3   : > { %v2504_v57 = vadd.f32 %v2503_v0, %v2502_v36 }
 0x2f4   : > { %v2816_v12 = vpop.f32.mrb[2].mxu1 }
 0x2f5   : > { %2351 = vst.msk [vmem:[%s3053_s7 + $0x98] sm:$0xff] %vm1770_vm5, %v2816_v12  ;;  %v2263_v32 = vpop.f32.mrb[3].mxu1  ;;  %v2457_v55 = vmul.f32 %v2816_v12, %v2816_v12  ;;  %v2402_v45 = vsel %vm1770_vm5, %v2816_v12, 0.0 }
 0x2f6   : > { %2350 = vst.msk [vmem:[%s3053_s7 + $0x90] sm:$0xff] %vm1770_vm5, %v2263_v32  ;;  %v2400_v2 = vsel %vm1770_vm5, %v2263_v32, 0.0  ;;  %v2456_v19 = vmul.f32 %v2263_v32, %v2263_v32 }
 0x2f7   : > { %v2401_v52 = vadd.f32 %v2400_v2, %v2399_v1  ;;  %v2507_v15 = vsel %vm1770_vm5, %v2457_v55, 0.0 }
 0x2f8   : > { %v2505_v7 = vsel %vm1770_vm5, %v2456_v19, 0.0 }
 0x2f9   : > { %v2506_v22 = vadd.f32 %v2505_v7, %v2504_v57  ;;  %v2403_v23 = vadd.f32 %v2402_v45, %v2401_v52 }
 0x2fb   : > { %v2508_v43 = vadd.f32 %v2507_v15, %v2506_v22 }
 0x30c   : > { %v2819_v3 = vpop.f32.mrb[4].mxu1 }
 0x30d   : > { %2353 = vst.msk [vmem:[%s3053_s7 + $0xa8] sm:$0xff] %vm1770_vm5, %v2819_v3  ;;  %v2273_v11 = vpop.f32.mrb[5].mxu1  ;;  %v2459_v27 = vmul.f32 %v2819_v3, %v2819_v3  ;;  %v2406_v44 = vsel %vm1770_vm5, %v2819_v3, 0.0 }
 0x30e   : > { %2352 = vst.msk [vmem:[%s3053_s7 + $0xa0] sm:$0xff] %vm1770_vm5, %v2273_v11  ;;  %v2404_v28 = vsel %vm1770_vm5, %v2273_v11, 0.0  ;;  %v2458_v46 = vmul.f32 %v2273_v11, %v2273_v11 }
 0x30f   : > { %v2405_v8 = vadd.f32 %v2404_v28, %v2403_v23  ;;  %v2511_v41 = vsel %vm1770_vm5, %v2459_v27, 0.0 }
 0x310   : > { %v2509_v33 = vsel %vm1770_vm5, %v2458_v46, 0.0 }
 0x311   : > { %v2510_v51 = vadd.f32 %v2509_v33, %v2508_v43  ;;  %v2407_v60 = vadd.f32 %v2406_v44, %v2405_v8 }
 0x313   : > { %v2512_v29 = vadd.f32 %v2511_v41, %v2510_v51 }
 0x324   : > { %v2822_v54 = vpop.f32.mrb[6].mxu1 }
 0x325   : > { %2355 = vst.msk [vmem:[%s3053_s7 + $0xb8] sm:$0xff] %vm1770_vm5, %v2822_v54  ;;  %v2283_v62 = vpop.f32.mrb[7].mxu1  ;;  %v2461_v58 = vmul.f32 %v2822_v54, %v2822_v54  ;;  %v2410_v9 = vsel %vm1770_vm5, %v2822_v54, 0.0 }
 0x326   : > { %2354 = vst.msk [vmem:[%s3053_s7 + $0xb0] sm:$0xff] %vm1770_vm5, %v2283_v62  ;;  %v2408_v4 = vsel %vm1770_vm5, %v2283_v62, 0.0  ;;  %v2460_v20 = vmul.f32 %v2283_v62, %v2283_v62 }
 0x327   : > { %v2409_v63 = vadd.f32 %v2408_v4, %v2407_v60  ;;  %v2515_v18 = vsel %vm1770_vm5, %v2461_v58, 0.0 }
 0x328   : > { %v2513_v42 = vsel %vm1770_vm5, %v2460_v20, 0.0 }
 0x329   : > { %v2514_v10 = vadd.f32 %v2513_v42, %v2512_v29  ;;  %v2411_v31 = vadd.f32 %v2410_v9, %v2409_v63  ;;  %v2364_v63 = vld [vmem:[#allocation3] sm:$0x1] }
 0x32b   : > { %v2516_v37 = vadd.f32 %v2515_v18, %v2514_v10  ;;  %v2437_v10 = vld [vmem:[#allocation5] sm:$0x1] }
 0x33c   : > { %v2825_v24 = vpop.f32.mrb[8].mxu1 }
 0x33d   : > { %2357 = vst.msk [vmem:[%s3053_s7 + $0xc8] sm:$0xff] %vm1770_vm5, %v2825_v24  ;;  %v2293_v61 = vpop.f32.mrb[9].mxu1  ;;  %v2463_v26 = vmul.f32 %v2825_v24, %v2825_v24  ;;  %v2414_v39 = vsel %vm1770_vm5, %v2825_v24, 0.0 }
 0x33e   : > { %2356 = vst.msk [vmem:[%s3053_s7 + $0xc0] sm:$0xff] %vm1770_vm5, %v2293_v61  ;;  %v2412_v5 = vsel %vm1770_vm5, %v2293_v61, 0.0  ;;  %v2462_v6 = vmul.f32 %v2293_v61, %v2293_v61 }
 0x33f   : > { %v2413_v30 = vadd.f32 %v2412_v5, %v2411_v31  ;;  %v2519_v59 = vsel %vm1770_vm5, %v2463_v26, 0.0 }
 0x340   : > { %v2517_v56 = vsel %vm1770_vm5, %v2462_v6, 0.0 }
 0x341   : > { %v2518_v21 = vadd.f32 %v2517_v56, %v2516_v37  ;;  %v2415_v13 = vadd.f32 %v2414_v39, %v2413_v30 }
 0x343   : > { %v2520_v14 = vadd.f32 %v2519_v59, %v2518_v21 }
 0x354   : > { %v2828_v48 = vpop.f32.mrb[10].mxu1 }
 0x355   : > { %2359 = vst.msk [vmem:[%s3053_s7 + $0xd8] sm:$0xff] %vm1770_vm5, %v2828_v48  ;;  %v2303_v34 = vpop.f32.mrb[11].mxu1  ;;  %v2465_v47 = vmul.f32 %v2828_v48, %v2828_v48  ;;  %v2418_v49 = vsel %vm1770_vm5, %v2828_v48, 0.0 }
 0x356   : > { %2358 = vst.msk [vmem:[%s3053_s7 + $0xd0] sm:$0xff] %vm1770_vm5, %v2303_v34  ;;  %v2416_v16 = vsel %vm1770_vm5, %v2303_v34, 0.0  ;;  %v2464_v40 = vmul.f32 %v2303_v34, %v2303_v34 }
 0x357   : > { %v2417_v50 = vadd.f32 %v2416_v16, %v2415_v13  ;;  %v2523_v53 = vsel %vm1770_vm5, %v2465_v47, 0.0 }
 0x358   : > { %v2521_v17 = vsel %vm1770_vm5, %v2464_v40, 0.0 }
 0x359   : > { %v2522_v35 = vadd.f32 %v2521_v17, %v2520_v14  ;;  %v2419_v38 = vadd.f32 %v2418_v49, %v2417_v50 }
 0x35b   : > { %v2524_v25 = vadd.f32 %v2523_v53, %v2522_v35 }
 0x36c   : > { %v2831_v36 = vpop.f32.mrb[12].mxu1 }
 0x36d   : > { %2361 = vst.msk [vmem:[%s3053_s7 + $0xe8] sm:$0xff] %vm1770_vm5, %v2831_v36  ;;  %v2313_v1 = vpop.f32.mrb[13].mxu1  ;;  %v2467_v0 = vmul.f32 %v2831_v36, %v2831_v36  ;;  %v2422_v55 = vsel %vm1770_vm5, %v2831_v36, 0.0 }
 0x36e   : > { %2360 = vst.msk [vmem:[%s3053_s7 + $0xe0] sm:$0xff] %vm1770_vm5, %v2313_v1  ;;  %v2420_v57 = vsel %vm1770_vm5, %v2313_v1, 0.0  ;;  %v2466_v12 = vmul.f32 %v2313_v1, %v2313_v1 }
 0x36f   : > { %v2421_v32 = vadd.f32 %v2420_v57, %v2419_v38  ;;  %v2527_v45 = vsel %vm1770_vm5, %v2467_v0, 0.0 }
 0x370   : > { %v2525_v2 = vsel %vm1770_vm5, %v2466_v12, 0.0 }
 0x371   : > { %v2526_v19 = vadd.f32 %v2525_v2, %v2524_v25  ;;  %v2423_v52 = vadd.f32 %v2422_v55, %v2421_v32 }
 0x373   : > { %v2528_v7 = vadd.f32 %v2527_v45, %v2526_v19 }
 0x37f   : > { %v2834_v22 = vpop.f32.mrb[14].mxu1 }
 0x380   : > { %2363 = vst.msk [vmem:[%s3053_s7 + $0xf8] sm:$0xff] %vm1770_vm5, %v2834_v22  ;;  %v2323_v23 = vpop.f32.mrb[15].mxu1  ;;  %v2469_v15 = vmul.f32 %v2834_v22, %v2834_v22  ;;  %v2426_v27 = vsel %vm1770_vm5, %v2834_v22, 0.0 }
 0x381   : > { %2362 = vst.msk [vmem:[%s3053_s7 + $0xf0] sm:$0xff] %vm1770_vm5, %v2323_v23  ;;  %v2424_v43 = vsel %vm1770_vm5, %v2323_v23, 0.0  ;;  %v2468_v3 = vmul.f32 %v2323_v23, %v2323_v23  ;;  %s2990_s7 = smov [#allocation5]  }
 0x382   : > { %v2425_v11 = vadd.f32 %v2424_v43, %v2423_v52  ;;  %v2531_v44 = vsel %vm1770_vm5, %v2469_v15, 0.0  ;;  %s2574_s8 = sshll.u32 %s2990_s7, 4  ;;  %s4393_s8 = int_to_ptr.vmem [resolvable:$true] %s2574_s8 }
 0x383   : > { %v2529_v28 = vsel %vm1770_vm5, %v2468_v3, 0.0 }
 0x384   : > { %v2427_v46 = vadd.f32 %v2426_v27, %v2425_v11  ;;  %v2530_v8 = vadd.f32 %v2529_v28, %v2528_v7 }
 0x386   : > { %v2428_v33 = vrot.slane %v2427_v46, 4  ;;  %v2532_v51 = vadd.f32 %v2531_v44, %v2530_v8 }
 0x388   : > { %v2429_v60 = vadd.f32 %v2428_v33, %v2427_v46  ;;  %v2533_v41 = vrot.slane %v2532_v51, 4 }
 0x38a   : > { %v2430_v29 = vrot.slane %v2429_v60, 2  ;;  %v2534_v54 = vadd.f32 %v2533_v41, %v2532_v51 }
 0x38c   : > { %v2431_v62 = vadd.f32 %v2430_v29, %v2429_v60  ;;  %v2535_v58 = vrot.slane %v2534_v54, 2 }
 0x38e   : > { %v2432_v4 = vrot.slane %v2431_v62, 1  ;;  %v2536_v20 = vadd.f32 %v2535_v58, %v2534_v54 }
 0x390   : > { %v2433_v9 = vadd.f32 %v2432_v4, %v2431_v62  ;;  %v2537_v42 = vrot.slane %v2536_v20, 1 }
 0x392   : > { %v2434_v31 = vadd.f32 %v2433_v9, %v2364_v63  ;;  %v2538_v18 = vadd.f32 %v2537_v42, %v2536_v20 }
 0x394   : > { %2436 = vst.msk [vmem:[#allocation3] sm:$0x1] %vm2435_vm13, %v2434_v31  ;;  %v2539_v37 = vadd.f32 %v2538_v18, %v2437_v10 }
 0x395   : > { %2909 = shalt.err (!%p2906_p13)
}
 0x396   : > { %s2910_s12 = scalar_lea.hbm %s4460_s5, 16 }
 0x397   : > { %p2911_p0 = scmp.ne.s32.totalorder %s4460_s5, %s2910_s12  ;;  %p2916_p3 = scmp.lt.u32.totalorder %s2910_s12, %s4460_s5 }
 0x399   : > { %p2912_p1 = pnand %p2911_p0, %p4388_p6 }
 0x39b   : > { %p2913_p2 = pneg %p2912_p1 }
 0x39d   : > { %p2918_p4 = pnand %p2916_p3, %p2913_p2 }
 0x39f   : > { %2921 = shalt.err (!%p2918_p4)
}
 0x3a0   : > { %2850 = dma.vmem_to_hbm [thread:$0]  (%p4388_p6), %s2562_s29, 16, %s4460_s5, [#allocation4]   ;;  %2540 = vst.msk [vmem:[#allocation5] sm:$0x1] %vm2435_vm13, %v2539_v37 }
 0x3a1   : > { %s2922_s19 = scalar_lea.vmem %s4393_s8, 16  ;;  %s2928_s20 = scalar_lea.vmem %s4393_s8, 32 }
 0x3a2   : > { %p2923_p5 = scmp.ne.s32.totalorder %s4393_s8, %s2922_s19  ;;  %p2929_p9 = scmp.lt.s32.totalorder %s4393_s8, %s4393_s8 }
 0x3a3   : > { %p2930_p10 = scmp.lt.s32.totalorder %s2928_s20, %s2922_s19 }
 0x3a4   : > { %p2924_p7 = pnand %p2923_p5, %p4388_p6 }
 0x3a5   : > { %p2931_p11 = por %p2930_p10, %p2929_p9 }
 0x3a6   : > { %p2925_p8 = pneg %p2924_p7 }
 0x3a8   : > { %p2932_p12 = pnand %p2931_p11, %p2925_p8 }
 0x3aa   : > { %2935 = shalt.err (!%p2932_p12)
}
 0x3ab   : > { %s2936_s25 = scalar_lea.hbm %s4461_s6, 16 }
 0x3ac   : > { %p2937_p13 = scmp.ne.s32.totalorder %s4461_s6, %s2936_s25  ;;  %p2942_p2 = scmp.lt.u32.totalorder %s2936_s25, %s4461_s6 }
 0x3ae   : > { %p2938_p0 = pnand %p2937_p13, %p4388_p6 }
 0x3b0   : > { %p2939_p1 = pneg %p2938_p0 }
 0x3b2   : > { %p2944_p3 = pnand %p2942_p2, %p2939_p1 }
 0x3b4   : > { %2947 = shalt.err (!%p2944_p3)
}
 0x3b5   : > { %2852 = dma.vmem_to_hbm [thread:$0]  (%p4388_p6), %s4393_s8, 16, %s4461_s6, [#allocation6]  }
 0x3b6   : > { %2961 = dma.done.wait (%p4388_p6), [#allocation4], 16  }
 0x3b7   : > { %2963 = vsyncadd (%p4388_p6), [#allocation4], 4294967280 }
 0x3b8   : > { %2965 = dma.done.wait (%p4388_p6), [#allocation6], 16  }
 0x3b9   : > { %2967 = vsyncadd (%p4388_p6), [#allocation6], 4294967280 }
 0x3ba PF: > { %s19_s21 = sadd.s32 1, %s2978_s21   ;;  %s4562_s0 = smov %s2974_s1 }
 0x3bb   : > { %p16_p4 = scmp.ge.s32.totalorder %s19_s21, 4   ;;  %s4563_s1 = smov %s4565_s23 }
 0x3bd   :  { %18 = sbr.rel (!%p16_p4) target bundleno = 3 (0x3), region = 94 }
 0x3c4   :  { %2602 = vsyncpa [#allocation4], 1 }
 0x3c5   :  { %2604 = vsyncpa [#allocation4 + $0x1], 1 }
 0x3c6   :  { %2605 = vsyncpa [#allocation6], 1 }

</bundles_post_ra>
